<compile_context>
chip_gen: v5e
topology: v5e:2x2
jax: 0.10.0
libtpu: 0.0.40
codegen_flags: <defaults>
</compile_context>

<pallas_src>
import math
import numpy as np
import jax
import jax.numpy as jnp
from jax import lax
from jax.experimental import pallas as pl
from jax.experimental.pallas import tpu as pltpu


# -------------------------------------------------------------------------------------------
# Stage 1: LayerNorm + exact GELU + fused input-gate projection (both directions, one matmul).
# -------------------------------------------------------------------------------------------
def _proj_kernel(x_ref, g_ref, b_ref, w_ref, bias_ref, gi_ref):
    Tt, B, D = x_ref.shape
    H3 = gi_ref.shape[-1]

    x = x_ref[...]
    mean = jnp.mean(x, axis=-1, keepdims=True)
    var = jnp.mean(jnp.square(x - mean), axis=-1, keepdims=True)
    xn = (x - mean) * lax.rsqrt(var + 1e-5)
    xn = xn * g_ref[0] + b_ref[0]

    # exact (erf) GELU, PyTorch F.gelu default
    xg = 0.5 * xn * (1.0 + lax.erf(xn * 0.7071067811865476))

    x2 = xg.reshape(Tt * B, D).astype(w_ref.dtype)          # optionally bf16 MXU inputs
    proj = jnp.dot(x2, w_ref[...], preferred_element_type=jnp.float32) + bias_ref[...]

    gi_ref[0] = proj[:, :H3].reshape(Tt, B, H3)             # forward-direction gates
    gi_ref[1] = proj[:, H3:].reshape(Tt, B, H3)             # backward-direction gates


# -------------------------------------------------------------------------------------------
# Stage 2: sequential bidirectional recurrence.  grid = (direction, time_chunk).
# -------------------------------------------------------------------------------------------
def _recur_kernel(gi_ref, whh_ref, bhhn_ref, out_ref, h_scr):
    d = pl.program_id(0)                                    # 0 = forward, 1 = backward
    c = pl.program_id(1)
    Tt, B, _ = gi_ref.shape
    H = out_ref.shape[-1]

    @pl.when(c == 0)                                        # first chunk of this direction
    def _():
        h_scr[...] = jnp.zeros_like(h_scr)

    whh = whh_ref[...]                                      # (H, 3H), this direction
    bhh_n = jnp.broadcast_to(bhhn_ref[...], (B, H))         # hoisted: one broadcast per chunk

    def step(i, h):
        t = i + d * (Tt - 1 - 2 * i)                        # fwd: i ; bwd: Tt-1-i
        gi = gi_ref[t]                                      # (B, 3H); r/z recurrent bias already folded in
        gh = jnp.dot(h, whh, preferred_element_type=jnp.float32)
        r = jax.nn.sigmoid(gi[:, 0:H] + gh[:, 0:H])
        z = jax.nn.sigmoid(gi[:, H:2 * H] + gh[:, H:2 * H])
        n = jnp.tanh(gi[:, 2 * H:] + r * (gh[:, 2 * H:] + bhh_n))
        h_new = (1.0 - z) * n + z * h
        out_ref[t] = h_new.astype(out_ref.dtype)
        return h_new

    h_scr[...] = lax.fori_loop(0, Tt, step, h_scr[...])     # carry h in registers within chunk


# -------------------------------------------------------------------------------------------
# Wrapper: parameter fusion / folding + the two pallas_calls.
# -------------------------------------------------------------------------------------------
def _divisor_tile(n, target):
    t = max(1, min(n, target))
    while n % t:
        t -= 1
    return t


def _vmem_limit(nbytes):
    # generous headroom, but never above v7x's 64 MiB physical per-core VMEM
    return int(min(max(2 * nbytes + (2 << 20), 16 << 20), 60 << 20))


def bidirectional_gru(x, params, *, time_tile=32, matmul_dtype=jnp.float32):
    """x: (B, T, rnn_dim) f32 -> (B, T, 2*hidden) f32.  Dropout == identity (eval mode).

    time_tile: time-chunk size for both stages; pick it so the double-buffered tiles stay well
        under VMEM (v7x has 64 MiB/core vs 128 MiB on v5e/v6e -> prefer smaller tiles there).
    matmul_dtype: jnp.bfloat16 on v6e/v7x gives ~2x MXU throughput on the projection
        (accumulation stays f32); default f32 to stay bit-close to an f32 reference.
    """
    B, T, D = x.shape
    H = params["whh_f"].shape[0]
    H3 = 3 * H
    if H % 128 != 0:
        raise ValueError("hidden size must be a multiple of 128 (lane-dense output blocks)")

    x_t = jnp.transpose(x, (1, 0, 2))                        # (T, B, D) time-major

    gamma = params["ln_gamma"].reshape(1, D)
    beta = params["ln_beta"].reshape(1, D)

    # Fuse both directions into one (D, 6H) weight, fold recurrent r/z biases into the
    # projection bias; only the n-gate recurrent bias stays inside the recurrence.
    def fold_bias(bih, bhh):
        return bih + jnp.concatenate([bhh[:2 * H], jnp.zeros((H,), bhh.dtype)])

    w_cat = jnp.concatenate([params["wih_f"], params["wih_b"]], axis=1).astype(matmul_dtype)
    b_cat = jnp.concatenate([fold_bias(params["bih_f"], params["bhh_f"]),
                             fold_bias(params["bih_b"], params["bhh_b"])]).reshape(1, 6 * H)
    whh_cat = jnp.stack([params["whh_f"], params["whh_b"]], axis=0)        # (2, H, 3H)
    bhh_n = jnp.stack([params["bhh_f"][2 * H:], params["bhh_b"][2 * H:]],
                      axis=0).reshape(2, 1, H)                             # (2, 1, H)

    tp = _divisor_tile(T, time_tile)
    tr = _divisor_tile(T, time_tile)
    nP = T // tp
    nC = T // tr
    w_bytes = jnp.dtype(matmul_dtype).itemsize

    # ---------------- stage 1: projection, pipelined over time tiles ----------------
    gi = pl.pallas_call(
        _proj_kernel,
        out_shape=jax.ShapeDtypeStruct((2, T, B, H3), jnp.float32),
        grid=(nP,),
        in_specs=[
            pl.BlockSpec((tp, B, D), lambda i: (i, 0, 0)),
            pl.BlockSpec((1, D), lambda i: (0, 0)),
            pl.BlockSpec((1, D), lambda i: (0, 0)),
            pl.BlockSpec((D, 6 * H), lambda i: (0, 0)),
            pl.BlockSpec((1, 6 * H), lambda i: (0, 0)),
        ],
        out_specs=pl.BlockSpec((2, tp, B, H3), lambda i: (0, i, 0, 0)),
        compiler_params=pltpu.CompilerParams(
            dimension_semantics=("parallel",),
            vmem_limit_bytes=_vmem_limit(
                2 * tp * B * D * 4 + 2 * 2 * tp * B * H3 * 4 + 2 * D * 6 * H * w_bytes),
        ),
    )(x_t, gamma, beta, w_cat, b_cat)

    # ---------- stage 2: recurrence, grid = (direction [parallel], time chunk [arbitrary]) ----
    out = pl.pallas_call(
        _recur_kernel,
        out_shape=jax.ShapeDtypeStruct((T, B, 2 * H), jnp.float32),
        grid=(2, nC),
        in_specs=[
            pl.BlockSpec((pl.Squeezed(), tr, B, H3),
                         lambda d, c: (d, c + d * (nC - 1 - 2 * c), 0, 0)),
            pl.BlockSpec((pl.Squeezed(), H, H3), lambda d, c: (d, 0, 0)),
            pl.BlockSpec((pl.Squeezed(), 1, H), lambda d, c: (d, 0, 0)),
        ],
        out_specs=pl.BlockSpec((tr, B, H),
                               lambda d, c: (c + d * (nC - 1 - 2 * c), 0, d)),
        scratch_shapes=[pltpu.VMEM((B, H), jnp.float32)],
        compiler_params=pltpu.CompilerParams(
            dimension_semantics=("parallel", "arbitrary"),
            vmem_limit_bytes=_vmem_limit(
                2 * tr * B * H3 * 4 + 2 * tr * B * H * 4 + 2 * H * H3 * 4 + B * H * 4),
        ),
    )(gi, whh_cat, bhh_n)

    # Dropout: identity in inference mode.
    return jnp.transpose(out, (1, 0, 2))                     # (B, T, 2H)


# -------------------------------------------------------------------------------------------
# Pure-JAX reference (for correctness check against the kernels).
# -------------------------------------------------------------------------------------------
def bidirectional_gru_ref(x, params):
    B, T, D = x.shape
    H = params["whh_f"].shape[0]

    mean = x.mean(-1, keepdims=True)
    var = ((x - mean) ** 2).mean(-1, keepdims=True)
    xn = (x - mean) / jnp.sqrt(var + 1e-5) * params["ln_gamma"] + params["ln_beta"]
    xg = 0.5 * xn * (1.0 + jax.scipy.special.erf(xn / jnp.sqrt(2.0)))
    xt = jnp.transpose(xg, (1, 0, 2))                        # (T, B, D)

    def run_dir(seq, wih, whh, bih, bhh):
        def step(h, xt_):
            gi = xt_ @ wih + bih
            gh = h @ whh + bhh
            r = jax.nn.sigmoid(gi[:, :H] + gh[:, :H])
            z = jax.nn.sigmoid(gi[:, H:2 * H] + gh[:, H:2 * H])
            n = jnp.tanh(gi[:, 2 * H:] + r * gh[:, 2 * H:])
            hn = (1.0 - z) * n + z * h
            return hn, hn
        _, ys = lax.scan(step, jnp.zeros((B, H), jnp.float32), seq)
        return ys

    yf = run_dir(xt, params["wih_f"], params["whh_f"], params["bih_f"], params["bhh_f"])
    yb = run_dir(xt[::-1], params["wih_b"], params["whh_b"], params["bih_b"], params["bhh_b"])[::-1]
    return jnp.transpose(jnp.concatenate([yf, yb], axis=-1), (1, 0, 2))


# -------------------------------------------------------------------------------------------
# Deterministic parameter init (PyTorch-style uniform(-1/sqrt(H), 1/sqrt(H))).
# Weights are stored PRE-TRANSPOSED: wih (rnn_dim, 3H), whh (H, 3H)  (== torch weight.T),
# so the wrapper never emits per-call transpose ops.
# -------------------------------------------------------------------------------------------
def init_params(key, rnn_dim, hidden):
    k = 1.0 / math.sqrt(hidden)
    ks = jax.random.split(key, 8)
    u = lambda kk, shape: jax.random.uniform(kk, shape, jnp.float32, -k, k)
    return {
        "ln_gamma": jnp.ones((rnn_dim,), jnp.float32),
        "ln_beta": jnp.zeros((rnn_dim,), jnp.float32),
        "wih_f": u(ks[0], (rnn_dim, 3 * hidden)),
        "whh_f": u(ks[1], (hidden, 3 * hidden)),
        "bih_f": u(ks[2], (3 * hidden,)),
        "bhh_f": u(ks[3], (3 * hidden,)),
        "wih_b": u(ks[4], (rnn_dim, 3 * hidden)),
        "whh_b": u(ks[5], (hidden, 3 * hidden)),
        "bih_b": u(ks[6], (3 * hidden,)),
        "bhh_b": u(ks[7], (3 * hidden,)),
    }


if __name__ == "__main__":
    # Small but hardware-aligned shapes: B multiple of 8 (sublanes), D/H multiples of 128 (lanes).
    B, T, RNN_DIM, HIDDEN = 8, 16, 128, 128
    key = jax.random.PRNGKey(0)
    kx, kp = jax.random.split(key)
    x = jax.random.normal(kx, (B, T, RNN_DIM), jnp.float32)
    params = init_params(kp, RNN_DIM, HIDDEN)

    # time_tile=8 -> 2 time tiles per stage, exercising the pipelined grid + chunked recurrence.
    out = jax.block_until_ready(bidirectional_gru(x, params, time_tile=8))
    ref = jax.block_until_ready(bidirectional_gru_ref(x, params))

    assert out.shape == (B, T, 2 * HIDDEN), out.shape
    np.testing.assert_allclose(np.asarray(out), np.asarray(ref), rtol=1e-4, atol=1e-4)
    print("KERNEL_OK")
</pallas_src>

<mosaic_0001>
module attributes {stable_mosaic.version = 11 : i64} {
  func.func @_proj_kernel(%arg0: i32, %arg1: memref<8x8x128xf32, #tpu.memory_space<vmem>>, %arg2: memref<1x128xf32, #tpu.memory_space<vmem>>, %arg3: memref<1x128xf32, #tpu.memory_space<vmem>>, %arg4: memref<128x768xf32, #tpu.memory_space<vmem>>, %arg5: memref<1x768xf32, #tpu.memory_space<vmem>>, %arg6: memref<2x8x8x384xf32, #tpu.memory_space<vmem>>) attributes {dimension_semantics = [#tpu.dimension_semantics<parallel>], iteration_bounds = array<i64: 2>, scalar_prefetch = 0 : i64, scratch_operands = 0 : i64, tpu.core_type = #tpu.core_type<tc>, window_params = [{transform_indices = @transform_0, window_bounds = array<i64: 8, 8, 128>}, {pipeline_mode = #tpu.pipeline_mode<synchronous>, transform_indices = @transform_1, window_bounds = array<i64: 1, 128>}, {pipeline_mode = #tpu.pipeline_mode<synchronous>, transform_indices = @transform_2, window_bounds = array<i64: 1, 128>}, {pipeline_mode = #tpu.pipeline_mode<synchronous>, transform_indices = @transform_3, window_bounds = array<i64: 128, 768>}, {pipeline_mode = #tpu.pipeline_mode<synchronous>, transform_indices = @transform_4, window_bounds = array<i64: 1, 768>}, {transform_indices = @transform_5, window_bounds = array<i64: 2, 8, 8, 384>}]} {
    %c0 = arith.constant 0 : index
    %c0_0 = arith.constant 0 : index
    %c0_1 = arith.constant 0 : index
    %0 = vector.load %arg1[%c0, %c0_0, %c0_1] : memref<8x8x128xf32, #tpu.memory_space<vmem>>, vector<8x8x128xf32>
    %cst = arith.constant dense<0.000000e+00> : vector<8x8xf32>
    %1 = vector.multi_reduction <add>, %0, %cst [2] : vector<8x8x128xf32> to vector<8x8xf32>
    %2 = vector.shape_cast %1 : vector<8x8xf32> to vector<8x8x1xf32>
    %cst_2 = arith.constant 1.280000e+02 : f32
    %3 = vector.broadcast %cst_2 : f32 to vector<8x8x1xf32>
    %4 = arith.divf %2, %3 : vector<8x8x1xf32>
    %5 = vector.broadcast %4 : vector<8x8x1xf32> to vector<8x8x128xf32>
    %6 = arith.subf %0, %5 : vector<8x8x128xf32>
    %7 = arith.mulf %6, %6 : vector<8x8x128xf32>
    %cst_3 = arith.constant dense<0.000000e+00> : vector<8x8xf32>
    %8 = vector.multi_reduction <add>, %7, %cst_3 [2] : vector<8x8x128xf32> to vector<8x8xf32>
    %9 = vector.shape_cast %8 : vector<8x8xf32> to vector<8x8x1xf32>
    %cst_4 = arith.constant 1.280000e+02 : f32
    %10 = vector.broadcast %cst_4 : f32 to vector<8x8x1xf32>
    %11 = arith.divf %9, %10 : vector<8x8x1xf32>
    %12 = vector.broadcast %4 : vector<8x8x1xf32> to vector<8x8x128xf32>
    %13 = arith.subf %0, %12 : vector<8x8x128xf32>
    %cst_5 = arith.constant 9.99999974E-6 : f32
    %14 = vector.broadcast %cst_5 : f32 to vector<8x8x1xf32>
    %15 = arith.addf %11, %14 : vector<8x8x1xf32>
    %16 = math.rsqrt %15 : vector<8x8x1xf32>
    %17 = vector.broadcast %16 : vector<8x8x1xf32> to vector<8x8x128xf32>
    %18 = arith.mulf %13, %17 : vector<8x8x128xf32>
    %c0_6 = arith.constant 0 : index
    %c0_7 = arith.constant 0 : index
    %19 = vector.load %arg2[%c0_6, %c0_7] : memref<1x128xf32, #tpu.memory_space<vmem>>, vector<1x128xf32>
    %20 = vector.shape_cast %19 : vector<1x128xf32> to vector<128xf32>
    %21 = vector.shape_cast %20 : vector<128xf32> to vector<1x1x128xf32>
    %22 = vector.broadcast %21 : vector<1x1x128xf32> to vector<8x8x128xf32>
    %23 = arith.mulf %18, %22 : vector<8x8x128xf32>
    %c0_8 = arith.constant 0 : index
    %c0_9 = arith.constant 0 : index
    %24 = vector.load %arg3[%c0_8, %c0_9] : memref<1x128xf32, #tpu.memory_space<vmem>>, vector<1x128xf32>
    %25 = vector.shape_cast %24 : vector<1x128xf32> to vector<128xf32>
    %26 = vector.shape_cast %25 : vector<128xf32> to vector<1x1x128xf32>
    %27 = vector.broadcast %26 : vector<1x1x128xf32> to vector<8x8x128xf32>
    %28 = arith.addf %23, %27 : vector<8x8x128xf32>
    %cst_10 = arith.constant 5.000000e-01 : f32
    %29 = vector.broadcast %cst_10 : f32 to vector<8x8x128xf32>
    %30 = arith.mulf %29, %28 : vector<8x8x128xf32>
    %cst_11 = arith.constant 0.707106769 : f32
    %31 = vector.broadcast %cst_11 : f32 to vector<8x8x128xf32>
    %32 = arith.mulf %28, %31 : vector<8x8x128xf32>
    %33 = math.erf %32 : vector<8x8x128xf32>
    %cst_12 = arith.constant 1.000000e+00 : f32
    %34 = vector.broadcast %cst_12 : f32 to vector<8x8x128xf32>
    %35 = arith.addf %34, %33 : vector<8x8x128xf32>
    %36 = arith.mulf %30, %35 : vector<8x8x128xf32>
    %37 = vector.shape_cast %36 : vector<8x8x128xf32> to vector<64x128xf32>
    %c0_13 = arith.constant 0 : index
    %c0_14 = arith.constant 0 : index
    %38 = vector.load %arg4[%c0_13, %c0_14] : memref<128x768xf32, #tpu.memory_space<vmem>>, vector<128x768xf32>
    %cst_15 = arith.constant dense<0.000000e+00> : vector<64x768xf32>
    %39 = tpu.matmul %37, %38, %cst_15 {dimension_numbers = #tpu.dot_dimension_numbers<[1], [0], [0], [1], [0, 0, 1, 1], [], []>} : vector<64x128xf32>, vector<128x768xf32>, vector<64x768xf32> -> vector<64x768xf32>
    %c0_16 = arith.constant 0 : index
    %c0_17 = arith.constant 0 : index
    %40 = vector.load %arg5[%c0_16, %c0_17] : memref<1x768xf32, #tpu.memory_space<vmem>>, vector<1x768xf32>
    %41 = vector.broadcast %40 : vector<1x768xf32> to vector<64x768xf32>
    %42 = arith.addf %39, %41 : vector<64x768xf32>
    %43 = vector.extract_strided_slice %42 {offsets = [0, 0], sizes = [64, 384], strides = [1, 1]} : vector<64x768xf32> to vector<64x384xf32>
    %44 = vector.shape_cast %43 : vector<64x384xf32> to vector<8x8x384xf32>
    %c0_18 = arith.constant 0 : index
    %c0_19 = arith.constant 0 : index
    %c0_20 = arith.constant 0 : index
    %c0_21 = arith.constant 0 : index
    %45 = vector.load %arg6[%c0_18, %c0_19, %c0_20, %c0_21] : memref<2x8x8x384xf32, #tpu.memory_space<vmem>>, vector<1x8x8x384xf32>
    %46 = vector.shape_cast %45 : vector<1x8x8x384xf32> to vector<8x8x384xf32>
    %47 = vector.shape_cast %44 : vector<8x8x384xf32> to vector<1x8x8x384xf32>
    tpu.vector_store %arg6[%c0_18, %c0_19, %c0_20, %c0_21], %47 {strides = array<i32>} : memref<2x8x8x384xf32, #tpu.memory_space<vmem>>, vector<1x8x8x384xf32>,
    %48 = vector.extract_strided_slice %42 {offsets = [0, 384], sizes = [64, 384], strides = [1, 1]} : vector<64x768xf32> to vector<64x384xf32>
    %49 = vector.shape_cast %48 : vector<64x384xf32> to vector<8x8x384xf32>
    %c1 = arith.constant 1 : index
    %c0_22 = arith.constant 0 : index
    %c0_23 = arith.constant 0 : index
    %c0_24 = arith.constant 0 : index
    %50 = vector.load %arg6[%c1, %c0_22, %c0_23, %c0_24] : memref<2x8x8x384xf32, #tpu.memory_space<vmem>>, vector<1x8x8x384xf32>
    %51 = vector.shape_cast %50 : vector<1x8x8x384xf32> to vector<8x8x384xf32>
    %52 = vector.shape_cast %49 : vector<8x8x384xf32> to vector<1x8x8x384xf32>
    tpu.vector_store %arg6[%c1, %c0_22, %c0_23, %c0_24], %52 {strides = array<i32>} : memref<2x8x8x384xf32, #tpu.memory_space<vmem>>, vector<1x8x8x384xf32>,
    return
  }
  func.func @transform_0(%arg0: i32) -> (i32, i32, i32) {
    %c0_i32 = arith.constant 0 : i32
    %c0_i32_0 = arith.constant 0 : i32
    %c0_i32_1 = arith.constant 0 : i32
    return %arg0, %c0_i32, %c0_i32_0 : i32, i32, i32
  }
  func.func @transform_1(%arg0: i32) -> (i32, i32) {
    %c0_i32 = arith.constant 0 : i32
    %c0_i32_0 = arith.constant 0 : i32
    %c0_i32_1 = arith.constant 0 : i32
    return %c0_i32, %c0_i32_0 : i32, i32
  }
  func.func @transform_2(%arg0: i32) -> (i32, i32) {
    %c0_i32 = arith.constant 0 : i32
    %c0_i32_0 = arith.constant 0 : i32
    %c0_i32_1 = arith.constant 0 : i32
    return %c0_i32, %c0_i32_0 : i32, i32
  }
  func.func @transform_3(%arg0: i32) -> (i32, i32) {
    %c0_i32 = arith.constant 0 : i32
    %c0_i32_0 = arith.constant 0 : i32
    %c0_i32_1 = arith.constant 0 : i32
    return %c0_i32, %c0_i32_0 : i32, i32
  }
  func.func @transform_4(%arg0: i32) -> (i32, i32) {
    %c0_i32 = arith.constant 0 : i32
    %c0_i32_0 = arith.constant 0 : i32
    %c0_i32_1 = arith.constant 0 : i32
    return %c0_i32, %c0_i32_0 : i32, i32
  }
  func.func @transform_5(%arg0: i32) -> (i32, i32, i32, i32) {
    %c0_i32 = arith.constant 0 : i32
    %c0_i32_0 = arith.constant 0 : i32
    %c0_i32_1 = arith.constant 0 : i32
    %c0_i32_2 = arith.constant 0 : i32
    return %c0_i32, %arg0, %c0_i32_0, %c0_i32_1 : i32, i32, i32, i32
  }
}

</mosaic_0001>

<bundles_post_ra>
// kernel: tpu_custom_call.1
= control target key start
LH: loop header
LB: loop body
LE: loop exit
PB: predicated region body
PF: predicated region fallthrough
CT: control target
= control target key end

     0   :  { %10 = vsyncpa [#allocation3], 0  ;;  %s2656_s0 = inlined_call_operand.hbm [shape: f32[16,8,128], index: 0, kind: input, shape index: {}]   ;;  %s2657_s1 = inlined_call_operand.hbm [shape: f32[1,128], index: 1, kind: input, shape index: {}]   ;;  %s2658_s2 = inlined_call_operand.vmem [shape: f32[1,128], index: 2, kind: input, shape index: {}]   ;;  %s2659_s3 = inlined_call_operand.hbm [shape: f32[128,768], index: 3, kind: input, shape index: {}]   ;;  %s2660_s4 = inlined_call_operand.hbm [shape: f32[1,768], index: 4, kind: input, shape index: {}]   ;;  %s2661_s5 = inlined_call_operand.hbm [shape: f32[2,16,8,384], index: 5, kind: output, shape index: {}]  }
   0x1   :  { %12 = vsyncpa [#allocation3 + $0x1], 0 }
   0x2   :  { %13 = vsyncpa [#allocation6], 0 }
   0x3   :  { %14 = vsyncpa [#allocation9], 0 }
   0x4   :  { %15 = vsyncpa [#allocation4], 0 }
   0x5   :  { %17 = vsyncpa [#allocation4 + $0x1], 0  ;;  %s1821_s18 = smov 0   ;;  %s1823_s19 = smov 0  }
   0x6   :  { %s1825_s20 = smov 0   ;;  %s1827_s21 = smov 0  }
   0x7 LB: > { %s1842_s22 = sadd.s32 4294967295, %s1774_s21   ;;  %s1391_s23 = sadd.s32 4294967294, %s1774_s21   ;;  %s1774_s21 = sphi %s1827_s21, %s2692_s21   ;;  %s1770_s20 = sphi %s1825_s20, %s2691_s20   ;;  %s1766_s19 = sphi %s1823_s19, %s2690_s19   ;;  %s1762_s18 = sphi %s1821_s18, %s2689_s18  }
   0x8   : > { %p43_p0 = scmp.ne.s32.totalorder %s1766_s19, %s1762_s18  ;;  %p44_p1 = scmp.eq.s32.totalorder %s1842_s22, 0 }
   0x9   : > { %p151_p2 = scmp.eq.s32.totalorder %s1842_s22, 1  ;;  %p157_p3 = scmp.eq.s32.totalorder %s1391_s23, 1 }
   0xa   : > { %p1851_p4 = por %p44_p1, %p43_p0  ;;  %p1392_p5 = scmp.ge.s32.totalorder %s1774_s21, 1 }
   0xb   : > { %p1856_p6 = por %p157_p3, %p43_p0  ;;  %p164_p7 = scmp.lt.s32.totalorder %s1774_s21, 3 }
   0xc   : > { %s176_s28 = sshll.u32 %s2657_s1, 4  ;;  %s1776_s30 = smov [#allocation5]   ;;  %s177_s28 = int_to_ptr.hbm [resolvable:$true] %s176_s28 }
   0xd   : > { %p1864_p8 = pnand %p1392_p5, %p164_p7  ;;  %s178_s6 = sshll.u32 %s1776_s30, 4  ;;  %s179_s6 = int_to_ptr.vmem [resolvable:$true] %s178_s6 }
   0xe   : > { %s190_s9 = sshll.u32 %s2659_s3, 4  ;;  %s1777_s11 = smov [#allocation7]   ;;  %s191_s9 = int_to_ptr.hbm [resolvable:$true] %s190_s9 }
   0xf   : > { %p1499_p10 = pneg %p1864_p8  ;;  %s192_s12 = sshll.u32 %s1777_s11, 4  ;;  %s193_s12 = int_to_ptr.vmem [resolvable:$true] %s192_s12 }
  0x10   : > { %s1778_s13 = smov 768   ;;  %s1779_s14 = smov 48  }
  0x11   : > { %p1876_p11 = pnand %p1499_p10, %p44_p1  ;;  %s205_s17 = sshll.u32 %s2660_s4, 4  ;;  %s206_s17 = int_to_ptr.hbm [resolvable:$true] %s205_s17 }
  0x12   : > { %s1780_s23 = smov [#allocation8]   ;;  %s1890_s27 = sadd.s32 1, %s1774_s21  }
  0x13   : > { %1502 = dma.hbm_to_vmem [thread:$0]  (!%p1876_p11), %s177_s28, 16, %s179_s6, [#allocation6]  }
  0x14   : > { %1505 = dma.hbm_to_vmem [thread:$0]  (!%p1876_p11), %s191_s9, 12288, %s193_s12, [#allocation6], %s1778_s13, %s1778_s13, %s1779_s14  }
  0x15   : > { %s207_s26 = sshll.u32 %s1780_s23, 4  ;;  %s27_s28 = ssub.s32 %s1774_s21, %s1890_s27  ;;  %s208_s26 = int_to_ptr.vmem [resolvable:$true] %s207_s26 }
  0x16   : > { %1508 = dma.hbm_to_vmem [thread:$0]  (!%p1876_p11), %s206_s17, 96, %s208_s26, [#allocation9]  }
  0x17   : > { %s30_s30 = sadd.s32 1, %s1770_s20  ;;  %p28_p12 = scmp.eq.s32.totalorder %s27_s28, 0 }
  0x18   : > { %p37_p13 = scmp.ne.s32.totalorder %s1770_s20, %s1766_s19  ;;  %p38_p0 = scmp.eq.s32.totalorder %s1774_s21, 0 }
  0x19   : > { %p1520_p3 = scmp.lt.s32.totalorder %s1774_s21, 2  ;;  %s218_s8 = sand.u32 1, %s1770_s20  }
  0x1a   : > { %s1900_s6 = scalar_select %p28_p12, %s1770_s20, %s30_s30  }
  0x1b   : > { %p39_p5 = por %p38_p0, %p37_p13  ;;  %p1904_p7 = por %p151_p2, %p37_p13 }
  0x1c   : > { %s1442_s9 = sshll.u32 %s1774_s21, 6  ;;  %s1397_s10 = sshll.u32 %s218_s8, 6 }
  0x1d   : > { %s227_s13 = scalar_lea.hbm %s2656_s0, %s1442_s9  ;;  %s222_s15 = scalar_lea.vmem [#allocation2], %s1397_s10 }
  0x1e   : > { %s228_s14 = sshll.u32 %s227_s13, 4  ;;  %s230_s16 = sshll.u32 %s222_s15, 4  ;;  %s229_s14 = int_to_ptr.hbm [resolvable:$true] %s228_s14  ;;  %s231_s16 = int_to_ptr.vmem [resolvable:$true] %s230_s16 }
  0x1f   : > { %p1915_p10 = pnand %p1520_p3, %p39_p5  ;;  %s219_s23 = scalar_lea.sflag [#allocation3], %s218_s8 }
  0x20   : > { %s1698_s26 = sshra.s32 %s229_s14, 4  ;;  %s1705_s10 = scalar_lea.hbm %s2656_s0, 128  ;;  %s1699_s26 = int_to_ptr.hbm [resolvable:$true] %s1698_s26 }
  0x21   : > { %s1700_s28 = scalar_lea.hbm %s1699_s26, 64  ;;  %p1702_p11 = pneg %p1915_p10 }
  0x22   : > { %p1701_p2 = scmp.ne.s32.totalorder %s1699_s26, %s1700_s28  ;;  %p1706_p0 = scmp.lt.s32.totalorder %s1699_s26, %s2656_s0 }
  0x23   : > { %p1707_p3 = scmp.lt.s32.totalorder %s1705_s10, %s1700_s28 }
  0x24   : > { %p1703_p12 = pnand %p1702_p11, %p1701_p2 }
  0x25   : > { %p1708_p5 = por %p1707_p3, %p1706_p0 }
  0x26   : > { %p1704_p13 = pneg %p1703_p12 }
  0x28   : > { %p1709_p9 = pnand %p1708_p5, %p1704_p13 }
  0x2a   : > { %1712 = shalt.err (!%p1709_p9)
}
  0x2b   : > { %s1781_s8 = smov 128   ;;  %s1782_s13 = smov 8  }
  0x2c   : > { %1512 = dma.hbm_to_vmem [thread:$0]  (!%p1915_p10), %s229_s14, 1024, %s231_s16, %s219_s23, %s1781_s8, %s1781_s8, %s1782_s13  }
  0x2d   : > { %242 = sbr.rel (%p1864_p8) target bundleno = 648 (0x288), region = 40  ;;  %s1932_s15 = sand.u32 (!%p1864_p8), 1, %s1766_s19  }
  0x2e   : > { %s1401_s30 = sshll.u32 (!%p1864_p8), %s1932_s15, 6  ;;  %s245_s26 = scalar_lea.sflag (!%p1864_p8), [#allocation3], %s1932_s15 }
  0x2f   : > { %s248_s28 = scalar_lea.vmem (!%p1864_p8), [#allocation2], %s1401_s30 }
  0x32   : > { %1745 = dma.done.wait (%p1851_p4), %s245_s26, 1024  }
  0x33   : > { %1747 = vsyncadd (%p1851_p4), %s245_s26, 4294966272 }
  0x34   : > { %1749 = dma.done.wait (%p44_p1), [#allocation6], 12304  }
  0x35   : > { %1751 = vsyncadd (%p44_p1), [#allocation6], 4294954992 }
  0x36   : > { %1753 = dma.done.wait (%p44_p1), [#allocation9], 96  }
  0x37   : > { %1755 = vsyncadd (%p44_p1), [#allocation9], 4294967200  ;;  %v299_v0 = vld [vmem:[%s248_s28 + $0x30] sm:$0xff]  ;;  %v298_v1 = vld [vmem:[%s248_s28 + $0x28] sm:$0xff]  ;;  %v1783_v8 = vmov 128.0   ;;  %s1475_s14 = smul.u32 384, %s1932_s15 }
  0x38   : > { %v297_v2 = vld [vmem:[%s248_s28 + $0x20] sm:$0xff]  ;;  %313 = vadd.xlane.f32.xlu2 %v299_v0  ;;  %311 = vadd.xlane.f32.xlu1 %v298_v1  ;;  %v295_v3 = vld [vmem:[%s248_s28 + $0x10] sm:$0xff]  ;;  %v294_v4 = vld [vmem:[%s248_s28 + $0x8] sm:$0xff]  ;;  %1574 = vrcp.f32 %v1783_v8  ;;  %s1250_s17 = scalar_lea.sflag [#allocation4], %s1932_s15 }
  0x39   : > { %309 = vadd.xlane.f32.xlu0 %v297_v2  ;;  %v293_v5 = vld [vmem:[%s248_s28] sm:$0xff]  ;;  %v296_v6 = vld [vmem:[%s248_s28 + $0x18] sm:$0xff]  ;;  %s2528_s16 = scalar_lea.vmem [#allocation10], %s1475_s14 }
  0x3a   : > { %v300_v7 = vld [vmem:[%s248_s28 + $0x38] sm:$0xff] }
  0x3e   : > { %v1575_v9 = vpop.eup %1574 }
  0x3f   : > { %v318_v10 = vmul.f32 128.0, %v1575_v9  ;;  %vm322_vm0 = vweird.f32 %v1575_v9 }
  0x40   : > { %305 = vadd.xlane.f32.xlu2 %v295_v3  ;;  %303 = vadd.xlane.f32.xlu1 %v294_v4 }
  0x41   : > { %301 = vadd.xlane.f32.xlu0 %v293_v5  ;;  %v319_v11 = vsub.f32 1.0, %v318_v10 }
  0x43   : > { %v320_v12 = vmul.f32 %v1575_v9, %v319_v11 }
  0x45   : > { %v321_v13 = vadd.f32 %v1575_v9, %v320_v12 }
  0x47   : > { %v1948_v14 = vsel %vm322_vm0, %v1575_v9, %v321_v13 }
  0x48   : > { %307 = vadd.xlane.f32.xlu1 %v296_v6 }
  0x49   : > { %315 = vadd.xlane.f32.xlu0 %v300_v7 }
  0xab   : > { %v314_v15 = vpop.xlane.xlu2 %313  ;;  %v312_v16 = vpop.xlane.xlu1 %311 }
  0xac   : > { %v329_v17 = vmul.f32 %v1948_v14, %v312_v16  ;;  %v310_v18 = vpop.xlane.xlu0 %309  ;;  %v330_v32 = vmul.f32 %v1948_v14, %v314_v15  ;;  %v1998_v15 = vld [vmem:[#allocation5] ss:$0 sm:$0xff] }
  0xad   : > { %v328_v19 = vmul.f32 %v1948_v14, %v310_v18 }
  0xae   : > { %v1952_v20 = vsub.f32 %v298_v1, %v329_v17  ;;  %v1976_v37 = vsub.f32 %v299_v0, %v330_v32 }
  0xaf   : > { %v1954_v21 = vsub.f32 %v297_v2, %v328_v19 }
  0xb0   : > { %v345_v22 = vmul.f32 %v1952_v20, %v1952_v20  ;;  %v346_v42 = vmul.f32 %v1976_v37, %v1976_v37 }
  0xb1   : > { %v344_v23 = vmul.f32 %v1954_v21, %v1954_v21 }
  0xb2   : > { %358 = vadd.xlane.f32.xlu1 %v345_v22 }
  0xb3   : > { %356 = vadd.xlane.f32.xlu2 %v344_v23  ;;  %v306_v24 = vpop.xlane.xlu2 %305  ;;  %v304_v25 = vpop.xlane.xlu1 %303 }
  0xb4   : > { %v326_v26 = vmul.f32 %v1948_v14, %v306_v24  ;;  %v325_v27 = vmul.f32 %v1948_v14, %v304_v25  ;;  %v302_v28 = vpop.xlane.xlu0 %301  ;;  %v2005_v24 = vld [vmem:[%s2658_s2] ss:$0 sm:$0xff] }
  0xb5   : > { %v324_v29 = vmul.f32 %v1948_v14, %v302_v28 }
  0xb6   : > { %v1963_v30 = vsub.f32 %v295_v3, %v326_v26  ;;  %v1965_v31 = vsub.f32 %v294_v4, %v325_v27 }
  0xb7   : > { %v1968_v33 = vsub.f32 %v293_v5, %v324_v29 }
  0xb8   : > { %v342_v34 = vmul.f32 %v1963_v30, %v1963_v30  ;;  %v341_v35 = vmul.f32 %v1965_v31, %v1965_v31 }
  0xb9   : > { %v340_v36 = vmul.f32 %v1968_v33, %v1968_v33 }
  0xba   : > { %352 = vadd.xlane.f32.xlu1 %v342_v34 }
  0xbb   : > { %350 = vadd.xlane.f32.xlu2 %v341_v35  ;;  %348 = vadd.xlane.f32.xlu0 %v340_v36  ;;  %v308_v39 = vpop.xlane.xlu1 %307 }
  0xbc   : > { %v316_v38 = vpop.xlane.xlu0 %315  ;;  %v327_v43 = vmul.f32 %v1948_v14, %v308_v39 }
  0xbd   : > { %v331_v40 = vmul.f32 %v1948_v14, %v316_v38 }
  0xbe   : > { %v1986_v45 = vsub.f32 %v296_v6, %v327_v43 }
  0xbf   : > { %v1979_v41 = vsub.f32 %v300_v7, %v331_v40 }
  0xc0   : > { %v343_v46 = vmul.f32 %v1986_v45, %v1986_v45 }
  0xc1   : > { %v347_v44 = vmul.f32 %v1979_v41, %v1979_v41 }
  0xc3   : > { %360 = vadd.xlane.f32.xlu0 %v346_v42  ;;  %362 = vadd.xlane.f32.xlu2 %v347_v44 }
  0xcb   : > { %354 = vadd.xlane.f32.xlu0 %v343_v46 }
 0x125   : > { %v359_v47 = vpop.xlane.xlu1 %358 }
 0x126   : > { %v357_v48 = vpop.xlane.xlu2 %356  ;;  %v369_v49 = vmul.f32 %v359_v47, %v1948_v14 }
 0x127   : > { %v368_v50 = vmul.f32 %v357_v48, %v1948_v14 }
 0x128   : > { %v377_v51 = vadd.f32 1e-05, %v369_v49 }
 0x129   : > { %v376_v52 = vadd.f32 1e-05, %v368_v50 }
 0x12a   : > { %1576 = vrsqrt.f32 %v377_v51  ;;  %vm436_vm1 = vweird.f32 %v377_v51 }
 0x12b   : > { %1578 = vrsqrt.f32 %v376_v52  ;;  %vm426_vm4 = vweird.f32 %v376_v52 }
 0x12d   : > { %v353_v53 = vpop.xlane.xlu1 %352 }
 0x12e   : > { %v351_v54 = vpop.xlane.xlu2 %350  ;;  %v366_v55 = vmul.f32 %v353_v53, %v1948_v14  ;;  %v349_v56 = vpop.xlane.xlu0 %348 }
 0x12f   : > { %v365_v57 = vmul.f32 %v351_v54, %v1948_v14  ;;  %v364_v58 = vmul.f32 %v349_v56, %v1948_v14 }
 0x130   : > { %v1577_v59 = vpop.eup %1576  ;;  %v374_v60 = vadd.f32 1e-05, %v366_v55 }
 0x131   : > { %v1579_v61 = vpop.eup %1578  ;;  %v431_v62 = vmul.f32 %v1577_v59, %v377_v51  ;;  %v373_v63 = vadd.f32 1e-05, %v365_v57  ;;  %v1995_v0 = vadd.f32 1e-05, %v364_v58  ;;  %vm437_vm2 = vweird.f32 %v1577_v59 }
 0x132   : > { %v421_v1 = vmul.f32 %v1579_v61, %v376_v52  ;;  %1580 = vrsqrt.f32 %v374_v60  ;;  %vm427_vm3 = vweird.f32 %v1579_v61  ;;  %vm438_vm5 = vmor %vm436_vm1, %vm437_vm2  ;;  %vm406_vm7 = vweird.f32 %v374_v60 }
 0x133   : > { %v432_v2 = vmul.f32 %v1577_v59, %v431_v62  ;;  %1582 = vrsqrt.f32 %v373_v63  ;;  %vm428_vm6 = vmor %vm426_vm4, %vm427_vm3  ;;  %vm396_vm9 = vweird.f32 %v373_v63  ;;  %vm386_vm14 = vweird.f32 %v1995_v0 }
 0x134   : > { %v422_v3 = vmul.f32 %v1579_v61, %v421_v1  ;;  %1584 = vrsqrt.f32 %v1995_v0 }
 0x135   : > { %v433_v4 = vmul.f32 0.5, %v432_v2 }
 0x136   : > { %v423_v5 = vmul.f32 0.5, %v422_v3  ;;  %v363_v9 = vpop.xlane.xlu2 %362 }
 0x137   : > { %v434_v6 = vsub.f32 1.5, %v433_v4  ;;  %v371_v23 = vmul.f32 %v363_v9, %v1948_v14 }
 0x138   : > { %v1581_v7 = vpop.eup %1580  ;;  %v424_v8 = vsub.f32 1.5, %v423_v5 }
 0x139   : > { %v1583_v10 = vpop.eup %1582  ;;  %v435_v11 = vmul.f32 %v1577_v59, %v434_v6  ;;  %v401_v12 = vmul.f32 %v1581_v7, %v374_v60  ;;  %vm407_vm8 = vweird.f32 %v1581_v7  ;;  %v2011_v40 = vadd.f32 1e-05, %v371_v23 }
 0x13a   : > { %v1585_v13 = vpop.eup %1584  ;;  %v425_v16 = vmul.f32 %v1579_v61, %v424_v8  ;;  %v391_v17 = vmul.f32 %v1583_v10, %v373_v63  ;;  %vm397_vm10 = vweird.f32 %v1583_v10  ;;  %vm408_vm11 = vmor %vm406_vm7, %vm407_vm8 }
 0x13b   : > { %v439_v18 = vsel %vm438_vm5, %v1577_v59, %v435_v11  ;;  %v402_v19 = vmul.f32 %v1581_v7, %v401_v12  ;;  %v381_v22 = vmul.f32 %v1585_v13, %v1995_v0  ;;  %vm387_vm12 = vweird.f32 %v1585_v13  ;;  %vm398_vm13 = vmor %vm396_vm9, %vm397_vm10 }
 0x13c   : > { %v429_v25 = vsel %vm428_vm6, %v1579_v61, %v425_v16  ;;  %v465_v26 = vmul.f32 %v439_v18, %v1952_v20  ;;  %v392_v27 = vmul.f32 %v1583_v10, %v391_v17  ;;  %1586 = vrsqrt.f32 %v2011_v40  ;;  %vm388_vm15 = vmor %vm386_vm14, %vm387_vm12 }
 0x13d   : > { %v464_v28 = vmul.f32 %v429_v25, %v1954_v21  ;;  %v403_v29 = vmul.f32 0.5, %v402_v19  ;;  %v382_v32 = vmul.f32 %v1585_v13, %v381_v22  ;;  %v361_v19 = vpop.xlane.xlu0 %360  ;;  %vm456_vm0 = vweird.f32 %v2011_v40 }
 0x13e   : > { %v477_v34 = vmul.f32 %v1998_v15, %v465_v26  ;;  %v393_v35 = vmul.f32 0.5, %v392_v27 }
 0x13f   : > { %v476_v36 = vmul.f32 %v1998_v15, %v464_v28  ;;  %v404_v38 = vsub.f32 1.5, %v403_v29  ;;  %v383_v39 = vmul.f32 0.5, %v382_v32 }
 0x140   : > { %v2014_v42 = vadd.f32 %v2005_v24, %v477_v34  ;;  %v394_v20 = vsub.f32 1.5, %v393_v35  ;;  %v370_v34 = vmul.f32 %v361_v19, %v1948_v14 }
 0x141   : > { %v2018_v21 = vadd.f32 %v2005_v24, %v476_v36  ;;  %v405_v43 = vmul.f32 %v1581_v7, %v404_v38  ;;  %v384_v44 = vsub.f32 1.5, %v383_v39 }
 0x142   : > { %v2021_v46 = vmul.f32 0.70710677, %v2014_v42  ;;  %v395_v47 = vmul.f32 %v1583_v10, %v394_v20  ;;  %v2045_v63 = vpop.eup %1586 }
 0x143   : > { %v2024_v48 = vmul.f32 0.70710677, %v2018_v21  ;;  %v409_v49 = vsel %vm408_vm11, %v1581_v7, %v405_v43  ;;  %v385_v50 = vmul.f32 %v1585_v13, %v384_v44  ;;  %v451_v9 = vmul.f32 %v2045_v63, %v2011_v40 }
 0x144   : > { %v708_v51 = vmul.f32 %v2021_v46, %v2021_v46  ;;  %v399_v52 = vsel %vm398_vm13, %v1583_v10, %v395_v47  ;;  %v462_v53 = vmul.f32 %v409_v49, %v1963_v30  ;;  %vm457_vm1 = vweird.f32 %v2045_v63 }
 0x145   : > { %v668_v54 = vmul.f32 %v2024_v48, %v2024_v48  ;;  %v461_v55 = vmul.f32 %v399_v52, %v1965_v31  ;;  %v389_v58 = vsel %vm388_vm15, %v1585_v13, %v385_v50  ;;  %v452_v25 = vmul.f32 %v2045_v63, %v451_v9  ;;  %vm458_vm2 = vmor %vm456_vm0, %vm457_vm1 }
 0x146   : > { %v2034_v56 = vmin.f32 %v708_v51, 16.0  ;;  %v474_v57 = vmul.f32 %v1998_v15, %v462_v53  ;;  %v460_v1 = vmul.f32 %v389_v58, %v1968_v33  ;;  %v2088_v51 = vadd.f32 1e-05, %v370_v34 }
 0x147   : > { %v2037_v59 = vmin.f32 %v668_v54, 16.0  ;;  %v473_v60 = vmul.f32 %v1998_v15, %v461_v55  ;;  %v453_v20 = vmul.f32 0.5, %v452_v25 }
 0x148   : > { %v710_v61 = vmul.f32 2.1237322e-06, %v2034_v56  ;;  %v721_v30 = vmul.f32 3.8918573e-05, %v2034_v56  ;;  %v2043_v62 = vadd.f32 %v2005_v24, %v474_v57  ;;  %v472_v33 = vmul.f32 %v1998_v15, %v460_v1 }
 0x149   : > { %v681_v31 = vmul.f32 3.8918573e-05, %v2037_v59  ;;  %v2049_v0 = vadd.f32 %v2005_v24, %v473_v60  ;;  %v670_v2 = vmul.f32 2.1237322e-06, %v2037_v59  ;;  %v454_v57 = vsub.f32 1.5, %v453_v20 }
 0x14a   : > { %v722_v3 = vadd.f32 0.001143296, %v721_v30  ;;  %v711_v5 = vadd.f32 0.00028619796, %v710_v61  ;;  %v2058_v8 = vmul.f32 0.70710677, %v2043_v62  ;;  %v2078_v32 = vadd.f32 %v2005_v24, %v472_v33 }
 0x14b   : > { %v682_v4 = vadd.f32 0.001143296, %v681_v31  ;;  %v2055_v7 = vmul.f32 0.70710677, %v2049_v0  ;;  %v671_v11 = vadd.f32 0.00028619796, %v670_v2  ;;  %1588 = vrsqrt.f32 %v2088_v51 }
 0x14c   : > { %v723_v6 = vmul.f32 %v722_v3, %v2034_v56  ;;  %v588_v16 = vmul.f32 %v2058_v8, %v2058_v8  ;;  %v712_v18 = vmul.f32 %v711_v5, %v2034_v56  ;;  %v2086_v50 = vmul.f32 0.70710677, %v2078_v32 }
 0x14d   : > { %v683_v10 = vmul.f32 %v682_v4, %v2037_v59  ;;  %v548_v13 = vmul.f32 %v2055_v7, %v2055_v7  ;;  %v672_v28 = vmul.f32 %v671_v11, %v2037_v59  ;;  %vm446_vm3 = vweird.f32 %v2088_v51 }
 0x14e   : > { %v724_v12 = vadd.f32 0.014752088, %v723_v6  ;;  %v2074_v27 = vmin.f32 %v588_v16, 16.0  ;;  %v713_v36 = vadd.f32 0.0036580483, %v712_v18  ;;  %v508_v1 = vmul.f32 %v2086_v50, %v2086_v50 }
 0x14f   : > { %v684_v17 = vadd.f32 0.014752088, %v683_v10  ;;  %v2070_v23 = vmin.f32 %v548_v13, 16.0  ;;  %v673_v49 = vadd.f32 0.0036580483, %v672_v28  ;;  %v455_v6 = vmul.f32 %v2045_v63, %v454_v57 }
 0x150   : > { %v725_v22 = vmul.f32 %v724_v12, %v2034_v56  ;;  %v601_v47 = vmul.f32 3.8918573e-05, %v2074_v27  ;;  %v714_v52 = vmul.f32 %v713_v36, %v2034_v56  ;;  %v2104_v11 = vmin.f32 %v508_v1, 16.0 }
 0x151   : > { %v685_v26 = vmul.f32 %v684_v17, %v2037_v59  ;;  %v561_v38 = vmul.f32 3.8918573e-05, %v2070_v23  ;;  %v674_v30 = vmul.f32 %v673_v49, %v2037_v59  ;;  %v550_v31 = vmul.f32 2.1237322e-06, %v2070_v23  ;;  %v2108_v40 = vpop.eup %1588 }
 0x152   : > { %v726_v29 = vadd.f32 0.112945676, %v725_v22  ;;  %v602_v54 = vadd.f32 0.001143296, %v601_v47  ;;  %v715_v2 = vadd.f32 0.05243302, %v714_v52  ;;  %v459_v19 = vsel %vm458_vm2, %v2045_v63, %v455_v6 }
 0x153   : > { %v686_v35 = vadd.f32 0.112945676, %v685_v26  ;;  %v562_v44 = vadd.f32 0.001143296, %v561_v38  ;;  %v675_v10 = vadd.f32 0.05243302, %v674_v30  ;;  %v441_v36 = vmul.f32 %v2108_v40, %v2088_v51 }
 0x154   : > { %v727_v39 = vmul.f32 %v726_v29, %v2034_v56  ;;  %v603_v61 = vmul.f32 %v602_v54, %v2074_v27  ;;  %v551_v33 = vadd.f32 0.00028619796, %v550_v31  ;;  %v716_v12 = vmul.f32 %v715_v2, %v2034_v56  ;;  %v929_v51 = vld [vmem:[#allocation7 + $0x2a8] sm:$0xff] }
 0x155   : > { %v687_v43 = vmul.f32 %v686_v35, %v2037_v59  ;;  %v563_v53 = vmul.f32 %v562_v44, %v2070_v23  ;;  %v590_v18 = vmul.f32 2.1237322e-06, %v2074_v27  ;;  %v676_v25 = vmul.f32 %v675_v10, %v2037_v59 }
 0x156   : > { %v728_v55 = vadd.f32 0.4994258, %v727_v39  ;;  %v604_v3 = vadd.f32 0.014752088, %v603_v61  ;;  %v552_v26 = vmul.f32 %v551_v33, %v2070_v23  ;;  %v510_v28 = vmul.f32 2.1237322e-06, %v2104_v11 }
 0x157   : > { %v688_v58 = vadd.f32 0.4994258, %v687_v43  ;;  %v564_v60 = vadd.f32 0.014752088, %v563_v53  ;;  %v717_v29 = vadd.f32 0.18741608, %v716_v12  ;;  %v467_v35 = vmul.f32 %v459_v19, %v1979_v41 }
 0x158   : > { %v729_v4 = vmul.f32 %v728_v55, %v2034_v56  ;;  %v605_v13 = vmul.f32 %v604_v3, %v2074_v27  ;;  %v591_v63 = vadd.f32 0.00028619796, %v590_v18  ;;  %v521_v39 = vmul.f32 3.8918573e-05, %v2104_v11 }
 0x159   : > { %v565_v5 = vmul.f32 %v564_v60, %v2070_v23  ;;  %v689_v9 = vmul.f32 %v688_v58, %v2037_v59  ;;  %v677_v20 = vadd.f32 0.18741608, %v676_v25  ;;  %v553_v43 = vadd.f32 0.0036580483, %v552_v26 }
 0x15a   : > { %v2110_v16 = vadd.f32 1.0, %v729_v4  ;;  %v606_v34 = vadd.f32 0.112945676, %v605_v13  ;;  %v511_v44 = vadd.f32 0.00028619796, %v510_v28  ;;  %v479_v49 = vmul.f32 %v1998_v15, %v467_v35 }
 0x15b   : > { %v566_v17 = vadd.f32 0.112945676, %v565_v5  ;;  %v2114_v22 = vadd.f32 1.0, %v689_v9  ;;  %v442_v41 = vmul.f32 %v2108_v40, %v441_v36  ;;  %v718_v52 = vmul.f32 %v717_v29, %v2034_v56  ;;  %v355_v29 = vpop.xlane.xlu0 %354 }
 0x15c   : > { %1590 = vrcp.f32 %v2110_v16  ;;  %v607_v47 = vmul.f32 %v606_v34, %v2074_v27  ;;  %v592_v54 = vmul.f32 %v591_v63, %v2074_v27  ;;  %v522_v55 = vadd.f32 0.001143296, %v521_v39  ;;  %v934_v63 = vld [vmem:[#allocation7 + $0x2d0] sm:$0xff]  ;;  %v935_v39 = vld [vmem:[#allocation7 + $0x2d8] sm:$0xff] }
 0x15d   : > { %v567_v38 = vmul.f32 %v566_v17, %v2070_v23  ;;  %1592 = vrcp.f32 %v2114_v22  ;;  %v678_v58 = vmul.f32 %v677_v20, %v2037_v59  ;;  %v554_v60 = vmul.f32 %v553_v43, %v2070_v23  ;;  %1443 = vmatpush.msra.mxu2 %v934_v63  ;;  %1459 = vmatpush.msra.mxu3 %v935_v39 }
 0x15e   : > { %v512_v61 = vmul.f32 %v511_v44, %v2104_v11  ;;  %v608_v31 = vadd.f32 0.4994258, %v607_v47  ;;  %v523_v1 = vmul.f32 %v522_v55, %v2104_v11  ;;  %v2140_v2 = vadd.f32 %v2005_v24, %v479_v49  ;;  %954 = vmatpush.msra.mxu0 %v934_v63  ;;  %995 = vmatpush.msra.mxu1 %v935_v39 }
 0x15f   : > { %v568_v53 = vadd.f32 0.4994258, %v567_v38  ;;  %v443_v56 = vmul.f32 0.5, %v442_v41  ;;  %v719_v3 = vadd.f32 1.1283791, %v718_v52  ;;  %v2144_v6 = vmul.f32 0.5, %v2018_v21  ;;  %1460 = vmatpush.msra.mxu3 %v929_v51 }
 0x160   : > { %v593_v5 = vadd.f32 0.0036580483, %v592_v54  ;;  %v2147_v59 = vmul.f32 0.5, %v2014_v42  ;;  %v2152_v10 = vadd.f32 1.1283791, %v678_v58  ;;  %v609_v17 = vmul.f32 %v608_v31, %v2074_v27  ;;  %v922_v31 = vld [vmem:[#allocation7 + $0x270] sm:$0xff]  ;;  %996 = vmatpush.msra.mxu1 %v929_v51 }
 0x161   : > { %v569_v4 = vmul.f32 %v568_v53, %v2070_v23  ;;  %v555_v12 = vadd.f32 0.05243302, %v554_v60  ;;  %v513_v13 = vadd.f32 0.0036580483, %v512_v61  ;;  %v524_v18 = vadd.f32 0.014752088, %v523_v1 }
 0x162   : > { %v2131_v57 = vpop.eup %1590  ;;  %v2158_v21 = vmul.f32 0.70710677, %v2140_v2  ;;  %v444_v42 = vsub.f32 1.5, %v443_v56  ;;  %v2161_v19 = vmul.f32 %v719_v3, %v2021_v46  ;;  %v740_v25 = vand.u32 2147483647, %v2110_v16  ;;  %v928_v53 = vld [vmem:[#allocation7 + $0x2a0] sm:$0xff] }
 0x163   : > { %v2136_v30 = vpop.eup %1592  ;;  %v732_v9 = vmul.f32 %v2131_v57, %v2110_v16  ;;  %v2164_v26 = vadd.f32 1.0, %v569_v4  ;;  %v594_v28 = vmul.f32 %v593_v5, %v2074_v27  ;;  %v525_v35 = vmul.f32 %v524_v18, %v2104_v11  ;;  %1444 = vmatpush.msra.mxu2 %v928_v53  ;;  %v923_v1 = vld [vmem:[#allocation7 + $0x278] sm:$0xff]  ;;  %955 = vmatpush.msra.mxu0 %v928_v53  ;;  %v905_v41 = vld [vmem:[#allocation7 + $0x1e8] sm:$0xff] }
 0x164   : > { %v692_v33 = vmul.f32 %v2136_v30, %v2114_v22  ;;  %v788_v36 = vmul.f32 %v2158_v21, %v2158_v21  ;;  %v445_v38 = vmul.f32 %v2108_v40, %v444_v42  ;;  %v556_v46 = vmul.f32 %v555_v12, %v2070_v23  ;;  %1461 = vmatpush.msra.mxu3 %v923_v1  ;;  %v917_v42 = vld [vmem:[#allocation7 + $0x248] sm:$0xff]  ;;  %v886_v12 = vld [vmem:[#allocation7 + $0x150] sm:$0xff] }
 0x165   : > { %v733_v34 = vsub.f32 1.0, %v732_v9  ;;  %v514_v43 = vmul.f32 %v513_v13, %v2104_v11  ;;  %vm447_vm4 = vweird.f32 %v2108_v40  ;;  %vm736_vm5 = vweird.f32 %v2110_v16  ;;  %1445 = vmatpush.msra.mxu2 %v922_v31  ;;  %956 = vmatpush.msra.mxu0 %v922_v31  ;;  %v899_v31 = vld [vmem:[#allocation7 + $0x1b8] sm:$0xff] }
 0x166   : > { %v693_v20 = vsub.f32 1.0, %v692_v33  ;;  %v2175_v44 = vadd.f32 1.0, %v609_v17  ;;  %v526_v47 = vadd.f32 0.112945676, %v525_v35  ;;  %v2177_v49 = vmin.f32 %v788_v36, 16.0  ;;  %vm2181_vm6 = vmor %vm446_vm3, %vm447_vm4  ;;  %997 = vmatpush.msra.mxu1 %v923_v1  ;;  %1462 = vmatpush.msra.mxu3 %v917_v42 }
 0x167   : > { %v367_v52 = vmul.f32 %v355_v29, %v1948_v14  ;;  %vm696_vm7 = vweird.f32 %v2114_v22  ;;  %v700_v54 = vand.u32 2147483647, %v2114_v22  ;;  %1594 = vrcp.f32 %v2164_v26 }
 0x168   : > { %v449_v55 = vsel %vm2181_vm6, %v2108_v40, %v445_v38  ;;  %v702_v58 = vand.u32 2147483648, %v2114_v22  ;;  %v734_v60 = vmul.f32 %v2131_v57, %v733_v34  ;;  %v527_v14 = vmul.f32 %v526_v47, %v2104_v11  ;;  %v911_v34 = vld [vmem:[#allocation7 + $0x218] sm:$0xff]  ;;  %v904_v47 = vld [vmem:[#allocation7 + $0x1e0] sm:$0xff]  ;;  %998 = vmatpush.msra.mxu1 %v917_v42 }
 0x169   : > { %v801_v61 = vmul.f32 3.8918573e-05, %v2177_v49  ;;  %v694_v56 = vmul.f32 %v2136_v30, %v693_v20  ;;  %v595_v3 = vadd.f32 0.05243302, %v594_v28  ;;  %v515_v4 = vadd.f32 0.05243302, %v514_v43  ;;  %1463 = vmatpush.msra.mxu3 %v911_v34 }
 0x16a   : > { %v466_v40 = vmul.f32 %v449_v55, %v1976_v37  ;;  %v557_v5 = vadd.f32 0.18741608, %v556_v46  ;;  %1596 = vrcp.f32 %v2175_v44  ;;  %v528_v9 = vadd.f32 0.4994258, %v527_v14  ;;  %v916_v37 = vld [vmem:[#allocation7 + $0x240] sm:$0xff]  ;;  %999 = vmatpush.msra.mxu1 %v911_v34 }
 0x16b   : > { %v2199_v33 = vadd.f32 1e-05, %v367_v52  ;;  %vm2201_vm8 = vcmp.eq.f32.partialorder %v740_v25, 8.507059e+37  ;;  %v742_v13 = vand.u32 2147483648, %v2110_v16  ;;  %v802_v17 = vadd.f32 0.001143296, %v801_v61  ;;  %1446 = vmatpush.msra.mxu2 %v916_v37  ;;  %957 = vmatpush.msra.mxu0 %v916_v37 }
 0x16c   : > { %v478_v18 = vmul.f32 %v1998_v15, %v466_v40  ;;  %vm697_vm9 = vweird.f32 %v2136_v30  ;;  %v735_v28 = vadd.f32 %v2131_v57, %v734_v60  ;;  %vm737_vm10 = vweird.f32 %v2131_v57  ;;  %v910_v25 = vld [vmem:[#allocation7 + $0x210] sm:$0xff]  ;;  %1464 = vmatpush.msra.mxu3 %v905_v41  ;;  %1000 = vmatpush.msra.mxu1 %v905_v41  ;;  %v880_v52 = vld [vmem:[#allocation7 + $0x120] sm:$0xff] }
 0x16d   : > { %v529_v29 = vmul.f32 %v528_v9, %v2104_v11  ;;  %v2211_v35 = vpop.eup %1594  ;;  %v695_v36 = vadd.f32 %v2136_v30, %v694_v56  ;;  %v516_v38 = vmul.f32 %v515_v4, %v2104_v11  ;;  %v803_v63 = vmul.f32 %v802_v17, %v2177_v49  ;;  %1447 = vmatpush.msra.mxu2 %v910_v25  ;;  %vm2232_vm12 = vmor %vm736_vm5, %vm737_vm10  ;;  %v898_v61 = vld [vmem:[#allocation7 + $0x1b0] sm:$0xff]  ;;  %v892_v9 = vld [vmem:[#allocation7 + $0x180] sm:$0xff] }
 0x16e   : > { %v2217_v39 = vadd.f32 %v2005_v24, %v478_v18  ;;  %v558_v20 = vmul.f32 %v557_v5, %v2070_v23  ;;  %v596_v46 = vmul.f32 %v595_v3, %v2074_v27  ;;  %1598 = vrsqrt.f32 %v2199_v33  ;;  %vm2245_vm13 = vmor %vm696_vm7, %vm697_vm9  ;;  %958 = vmatpush.msra.mxu0 %v910_v25  ;;  %1465 = vmatpush.msra.mxu3 %v899_v31  ;;  %v887_v25 = vld [vmem:[#allocation7 + $0x158] sm:$0xff] }
 0x16f   : > { %v2221_v43 = vadd.f32 1.0, %v529_v29  ;;  %vm2224_vm11 = vcmp.eq.f32.partialorder %v700_v54, 8.507059e+37  ;;  %v703_v53 = vor.u32 1.1754944e-38, %v702_v58  ;;  %v804_v55 = vadd.f32 0.014752088, %v803_v63  ;;  %1448 = vmatpush.msra.mxu2 %v904_v47  ;;  %1001 = vmatpush.msra.mxu1 %v899_v31  ;;  %v875_v31 = vld [vmem:[#allocation7 + $0xf8] sm:$0xff] }
 0x170   : > { %v2237_v51 = vmul.f32 0.70710677, %v2217_v39  ;;  %v2239_v60 = vpop.eup %1596  ;;  %v739_v16 = vsel %vm2232_vm12, %v2131_v57, %v735_v28  ;;  %v743_v58 = vor.u32 1.1754944e-38, %v742_v13  ;;  %v572_v14 = vmul.f32 %v2211_v35, %v2164_v26  ;;  %v893_v13 = vld [vmem:[#allocation7 + $0x188] sm:$0xff]  ;;  %959 = vmatpush.msra.mxu0 %v904_v47 }
 0x171   : > { %1600 = vrcp.f32 %v2221_v43  ;;  %v699_v22 = vsel %vm2245_vm13, %v2136_v30, %v695_v36  ;;  %v517_v1 = vadd.f32 0.18741608, %v516_v38  ;;  %v790_v56 = vmul.f32 2.1237322e-06, %v2177_v49  ;;  %1449 = vmatpush.msra.mxu2 %v898_v61  ;;  %1466 = vmatpush.msra.mxu3 %v893_v13 }
 0x172   : > { %v805_v3 = vmul.f32 %v804_v55, %v2177_v49  ;;  %v680_v57 = vmul.f32 %v2152_v10, %v2024_v48  ;;  %v2262_v4 = vadd.f32 1.1283791, %v558_v20  ;;  %v597_v40 = vadd.f32 0.18741608, %v596_v46  ;;  %960 = vmatpush.msra.mxu0 %v898_v61  ;;  %1002 = vmatpush.msra.mxu1 %v893_v13  ;;  %v874_v61 = vld [vmem:[#allocation7 + $0xf0] sm:$0xff]  ;;  %v868_v13 = vld [vmem:[#allocation7 + $0xc0] sm:$0xff] }
 0x173   : > { %v748_v5 = vmul.f32 %v2237_v51, %v2237_v51  ;;  %v744_v30 = vsel %vm2201_vm8, %v743_v58, %v739_v16  ;;  %v580_v17 = vand.u32 2147483647, %v2164_v26  ;;  %v2271_v18 = vmul.f32 %v2239_v60, %v2175_v44  ;;  %1450 = vmatpush.msra.mxu2 %v892_v9  ;;  %1467 = vmatpush.msra.mxu3 %v887_v25 }
 0x174   : > { %v806_v48 = vadd.f32 0.112945676, %v805_v3  ;;  %v2273_v10 = vpop.eup %1598  ;;  %v704_v37 = vsel %vm2224_vm11, %v703_v53, %v699_v22  ;;  %v573_v42 = vsub.f32 1.0, %v572_v14  ;;  %v582_v28 = vand.u32 2147483648, %v2164_v26  ;;  %v881_v53 = vld [vmem:[#allocation7 + $0x128] sm:$0xff]  ;;  %961 = vmatpush.msra.mxu0 %v892_v9  ;;  %1003 = vmatpush.msra.mxu1 %v887_v25 }
 0x175   : > { %v2278_v29 = vmin.f32 %v748_v5, 16.0  ;;  %v518_v34 = vmul.f32 %v517_v1, %v2104_v11  ;;  %v791_v36 = vadd.f32 0.00028619796, %v790_v56  ;;  %v411_v63 = vmul.f32 %v2273_v10, %v2199_v33  ;;  %1451 = vmatpush.msra.mxu2 %v886_v12  ;;  %1468 = vmatpush.msra.mxu3 %v881_v53 }
 0x176   : > { %v807_v38 = vmul.f32 %v806_v48, %v2177_v49  ;;  %v2287_v46 = vmul.f32 %v744_v30, %v2161_v19  ;;  %v2290_v47 = vmul.f32 %v597_v40, %v2074_v27  ;;  %v2294_v23 = vmul.f32 %v704_v37, %v680_v57  ;;  %962 = vmatpush.msra.mxu0 %v886_v12  ;;  %v869_v30 = vld [vmem:[#allocation7 + $0xc8] sm:$0xff] }
 0x177   : > { %v2284_v20 = vpop.eup %1600  ;;  %v750_v41 = vmul.f32 2.1237322e-06, %v2278_v29  ;;  %v761_v11 = vmul.f32 3.8918573e-05, %v2278_v29  ;;  %v613_v55 = vsub.f32 1.0, %v2271_v18  ;;  %v574_v27 = vmul.f32 %v2211_v35, %v573_v42  ;;  %1452 = vmatpush.msra.mxu2 %v880_v52  ;;  %1469 = vmatpush.msra.mxu3 %v875_v31  ;;  %v844_v18 = vld [vmem:[#allocation7] sm:$0xff] }
 0x178   : > { %v532_v54 = vmul.f32 %v2284_v20, %v2221_v43  ;;  %v808_v19 = vadd.f32 0.4994258, %v807_v38  ;;  %vm576_vm14 = vweird.f32 %v2164_v26  ;;  %v412_v14 = vmul.f32 %v2273_v10, %v411_v63  ;;  %963 = vmatpush.msra.mxu0 %v880_v52  ;;  %1004 = vmatpush.msra.mxu1 %v881_v53  ;;  %v863_v63 = vld [vmem:[#allocation7 + $0x98] sm:$0xff] }
 0x179   : > { %v751_v16 = vadd.f32 0.00028619796, %v750_v41  ;;  %v762_v58 = vadd.f32 0.001143296, %v761_v11  ;;  %v519_v22 = vadd.f32 1.1283791, %v518_v34  ;;  %v792_v56 = vmul.f32 %v791_v36, %v2177_v49  ;;  %1453 = vmatpush.msra.mxu2 %v874_v61  ;;  %1470 = vmatpush.msra.mxu3 %v869_v30 }
 0x17a   : > { %v533_v1 = vsub.f32 1.0, %v532_v54  ;;  %v809_v3 = vmul.f32 %v808_v19, %v2177_v49  ;;  %v542_v57 = vand.u32 2147483648, %v2221_v43  ;;  %v413_v9 = vmul.f32 0.5, %v412_v14  ;;  %v862_v36 = vld [vmem:[#allocation7 + $0x90] sm:$0xff]  ;;  %964 = vmatpush.msra.mxu0 %v874_v61  ;;  %1005 = vmatpush.msra.mxu1 %v875_v31  ;;  %v857_v19 = vld [vmem:[#allocation7 + $0x68] sm:$0xff] }
 0x17b   : > { %v752_v40 = vmul.f32 %v751_v16, %v2278_v29  ;;  %v763_v5 = vmul.f32 %v762_v58, %v2278_v29  ;;  %vm537_vm15 = vweird.f32 %v2284_v20  ;;  %v540_v37 = vand.u32 2147483647, %v2221_v43  ;;  %1454 = vmatpush.msra.mxu2 %v868_v13  ;;  %1471 = vmatpush.msra.mxu3 %v863_v63 }
 0x17c   : > { %v534_v48 = vmul.f32 %v2284_v20, %v533_v1  ;;  %v2310_v42 = vadd.f32 1.0, %v809_v3  ;;  %vm577_vm0 = vweird.f32 %v2211_v35  ;;  %v414_v34 = vsub.f32 1.5, %v413_v9  ;;  %965 = vmatpush.msra.mxu0 %v868_v13  ;;  %1006 = vmatpush.msra.mxu1 %v869_v30  ;;  %v851_v1 = vld [vmem:[#allocation7 + $0x38] sm:$0xff]  ;;  %v845_v9 = vld [vmem:[#allocation7 + $0x8] sm:$0xff] }
 0x17d   : > { %v753_v12 = vadd.f32 0.0036580483, %v752_v40  ;;  %v764_v25 = vadd.f32 0.014752088, %v763_v5  ;;  %vm536_vm1 = vweird.f32 %v2221_v43  ;;  %vm416_vm2 = vweird.f32 %v2199_v33  ;;  %1455 = vmatpush.msra.mxu2 %v862_v36  ;;  %v856_v43 = vld [vmem:[#allocation7 + $0x60] sm:$0xff]  ;;  %vm2341_vm7 = vmor %vm576_vm14, %vm577_vm0  ;;  %1472 = vmatpush.msra.mxu3 %v857_v19 }
 0x17e   : > { %v535_v38 = vadd.f32 %v2284_v20, %v534_v48  ;;  %vm417_vm3 = vweird.f32 %v2273_v10  ;;  %v575_v41 = vadd.f32 %v2211_v35, %v574_v27  ;;  %vm2320_vm4 = vmor %vm536_vm1, %vm537_vm15  ;;  %v543_v52 = vor.u32 1.1754944e-38, %v542_v57  ;;  %966 = vmatpush.msra.mxu0 %v862_v36  ;;  %1007 = vmatpush.msra.mxu1 %v863_v63  ;;  %v936_v48 = vld [vmem:[#allocation7 + $0x2e0] sm:$0xff] }
 0x17f   : > { %v793_v53 = vadd.f32 0.0036580483, %v792_v56  ;;  %v765_v54 = vmul.f32 %v764_v25, %v2278_v29  ;;  %vm541_vm5 = vcmp.eq.f32.partialorder %v540_v37, 8.507059e+37  ;;  %v415_v27 = vmul.f32 %v2273_v10, %v414_v34  ;;  %vm418_vm6 = vmor %vm416_vm2, %vm417_vm3  ;;  %1456 = vmatpush.msra.mxu2 %v856_v43  ;;  %1473 = vmatpush.msra.mxu3 %v851_v1  ;;  %v937_v37 = vld [vmem:[#allocation7 + $0x2e8] sm:$0xff] }
 0x180   : > { %v539_v16 = vsel %vm2320_vm4, %v2284_v20, %v535_v38  ;;  %v1409_v58 = vclamps-f32 %v2294_v23, 1.0  ;;  %v520_v14 = vmul.f32 %v519_v22, %v2086_v50  ;;  %1602 = vrcp.f32 %v2310_v42  ;;  %v850_v20 = vld [vmem:[#allocation7 + $0x30] sm:$0xff]  ;;  %967 = vmatpush.msra.mxu0 %v856_v43  ;;  %1008 = vmatpush.msra.mxu1 %v857_v19  ;;  %v925_v19 = vld [vmem:[#allocation7 + $0x288] sm:$0xff] }
 0x181   : > { %v544_v61 = vsel %vm541_vm5, %v543_v52, %v539_v16  ;;  %v754_v31 = vmul.f32 %v753_v12, %v2278_v29  ;;  %v614_v23 = vmul.f32 %v2239_v60, %v613_v55  ;;  %v766_v22 = vadd.f32 0.112945676, %v765_v54  ;;  %1457 = vmatpush.msra.mxu2 %v850_v20  ;;  %1474 = vmatpush.msra.mxu3 %v845_v9  ;;  %v924_v54 = vld [vmem:[#allocation7 + $0x280] sm:$0xff] }
 0x182   : > { %v419_v33 = vsel %vm418_vm6, %v2273_v10, %v415_v27  ;;  %v832_v56 = vadd.f32 1.0, %v1409_v58  ;;  %v579_v3 = vsel %vm2341_vm7, %v2211_v35, %v575_v41  ;;  %v583_v57 = vor.u32 1.1754944e-38, %v582_v28  ;;  %968 = vmatpush.msra.mxu0 %v850_v20  ;;  %1009 = vmatpush.msra.mxu1 %v851_v1 }
 0x183   : > { %v545_v40 = vmul.f32 %v544_v61, %v520_v14  ;;  %v463_v5 = vmul.f32 %v419_v33, %v1986_v45  ;;  %v794_v55 = vmul.f32 %v793_v53, %v2177_v49  ;;  %v767_v10 = vmul.f32 %v766_v22, %v2278_v29  ;;  %1458 = vmatpush.msra.mxu2 %v844_v18  ;;  %v918_v61 = vld [vmem:[#allocation7 + $0x250] sm:$0xff] }
 0x184   : > { %v2358_v13 = vmul.f32 %v832_v56, %v2144_v6  ;;  %v1410_v35 = vclamps-f32 %v2287_v46, 1.0  ;;  %v560_v28 = vmul.f32 %v2262_v4, %v2055_v7  ;;  %vm581_vm8 = vcmp.eq.f32.partialorder %v580_v17, 8.507059e+37  ;;  %v930_v4 = vld [vmem:[#allocation7 + $0x2b0] sm:$0xff]  ;;  %v931_v17 = vld [vmem:[#allocation7 + $0x2b8] sm:$0xff]  ;;  %1077 = vmatpush.msrb.mxu3 %v937_v37  ;;  %969 = vmatpush.msra.mxu0 %v844_v18  ;;  %v913_v18 = vld [vmem:[#allocation7 + $0x228] sm:$0xff] }
 0x185   : > { %v755_v45 = vadd.f32 0.05243302, %v754_v31  ;;  %v475_v30 = vmul.f32 %v1998_v15, %v463_v5  ;;  %v584_v12 = vsel %vm581_vm8, %v583_v57, %v579_v3  ;;  %v615_v6 = vadd.f32 %v2239_v60, %v614_v23  ;;  %1036 = vmatpush.msrb.mxu2 %v936_v48  ;;  %1010 = vmatpush.msra.mxu1 %v845_v9  ;;  %v919_v31 = vld [vmem:[#allocation7 + $0x258] sm:$0xff]  ;;  %v938_v22 = vld [vmem:[#allocation7 + $0x2f0] sm:$0xff]  ;;  %v912_v57 = vld [vmem:[#allocation7 + $0x220] sm:$0xff] }
 0x186   : > { %vm617_vm9 = vweird.f32 %v2239_v60  ;;  %v768_v25 = vadd.f32 0.4994258, %v767_v10  ;;  %982 = vmatmul.f32.vlgmr.msra.gmra.mxu2 %v2358_v13  ;;  %v2369_v7 = vpop.eup %1602  ;;  %vm616_vm10 = vweird.f32 %v2175_v44  ;;  %v622_v26 = vand.u32 2147483648, %v2175_v44  ;;  %1023 = vmatmul.f32.vlgmr.msra.gmra.mxu3 %v2358_v13  ;;  %v939_v3 = vld [vmem:[#allocation7 + $0x2f8] sm:$0xff]  ;;  %v932_v9 = vld [vmem:[#allocation7 + $0x2c0] sm:$0xff]  ;;  %v933_v10 = vld [vmem:[#allocation7 + $0x2c8] sm:$0xff] }
 0x187   : > { %v2374_v15 = vadd.f32 %v2005_v24, %v475_v30  ;;  %v1405_v46 = vclamps-f32 %v545_v40, 1.0  ;;  %v620_v34 = vand.u32 2147483647, %v2175_v44  ;;  %v795_v36 = vadd.f32 0.05243302, %v794_v55  ;;  %vm2386_vm11 = vmor %vm616_vm10, %vm617_vm9  ;;  %1037 = vmatpush.msrb.mxu2 %v930_v4  ;;  %1078 = vmatpush.msrb.mxu3 %v931_v17  ;;  %v907_v48 = vld [vmem:[#allocation7 + $0x1f8] sm:$0xff] }
 0x188   : > { %v769_v38 = vmul.f32 %v768_v25, %v2278_v29  ;;  %v833_v63 = vadd.f32 1.0, %v1410_v35  ;;  %v2379_v41 = vmul.f32 %v584_v12, %v560_v28  ;;  %v599_v11 = vadd.f32 1.1283791, %v2290_v47  ;;  %1118 = vmatpush.msrb.mxu0 %v938_v22  ;;  %v906_v35 = vld [vmem:[#allocation7 + $0x1f0] sm:$0xff]  ;;  %1159 = vmatpush.msrb.mxu1 %v939_v3  ;;  %v927_v25 = vld [vmem:[#allocation7 + $0x298] sm:$0xff] }
 0x189   : > { %v756_v52 = vmul.f32 %v755_v45, %v2278_v29  ;;  %v2392_v53 = vmul.f32 0.70710677, %v2374_v15  ;;  %v619_v47 = vsel %vm2386_vm11, %v2239_v60, %v615_v6  ;;  %v812_v43 = vmul.f32 %v2369_v7, %v2310_v42  ;;  %1038 = vmatpush.msrb.mxu2 %v924_v54  ;;  %1079 = vmatpush.msrb.mxu3 %v925_v19  ;;  %v926_v37 = vld [vmem:[#allocation7 + $0x290] sm:$0xff]  ;;  %v895_v19 = vld [vmem:[#allocation7 + $0x198] sm:$0xff] }
 0x18a   : > { %v2399_v44 = vadd.f32 1.0, %v769_v38  ;;  %v828_v16 = vadd.f32 1.0, %v1405_v46  ;;  %v623_v27 = vor.u32 1.1754944e-38, %v622_v26  ;;  %v492_v58 = vmul.f32 0.5, %v2078_v32  ;;  %1119 = vmatpush.msrb.mxu0 %v932_v9  ;;  %v900_v26 = vld [vmem:[#allocation7 + $0x1c0] sm:$0xff]  ;;  %1160 = vmatpush.msrb.mxu1 %v933_v10  ;;  %v894_v24 = vld [vmem:[#allocation7 + $0x190] sm:$0xff] }
 0x18b   : > { %v628_v14 = vmul.f32 %v2392_v53, %v2392_v53  ;;  %vm621_vm12 = vcmp.eq.f32.partialorder %v620_v34, 8.507059e+37  ;;  %v796_v60 = vmul.f32 %v795_v36, %v2177_v49  ;;  %v2407_v20 = vmul.f32 %v833_v63, %v2147_v59  ;;  %1039 = vmatpush.msrb.mxu2 %v918_v61  ;;  %1080 = vmatpush.msrb.mxu3 %v919_v31  ;;  %v901_v34 = vld [vmem:[#allocation7 + $0x1c8] sm:$0xff]  ;;  %v920_v36 = vld [vmem:[#allocation7 + $0x260] sm:$0xff]  ;;  %v902_v10 = vld [vmem:[#allocation7 + $0x1d0] sm:$0xff] }
 0x18c   : > { %1604 = vrcp.f32 %v2399_v44  ;;  %v624_v1 = vsel %vm621_vm12, %v623_v27, %v619_v47  ;;  %v757_v50 = vadd.f32 0.18741608, %v756_v52  ;;  %v2411_v32 = vmul.f32 %v828_v16, %v492_v58  ;;  %1120 = vmatpush.msrb.mxu0 %v926_v37  ;;  %1161 = vmatpush.msrb.mxu1 %v927_v25  ;;  %v914_v58 = vld [vmem:[#allocation7 + $0x230] sm:$0xff]  ;;  %v896_v25 = vld [vmem:[#allocation7 + $0x1a0] sm:$0xff] }
 0x18d   : > { %v2409_v23 = vmin.f32 %v628_v14, 16.0  ;;  %v600_v33 = vmul.f32 %v599_v11, %v2058_v8  ;;  %v813_v56 = vsub.f32 1.0, %v812_v43  ;;  %v1406_v40 = vclamps-f32 %v2379_v41, 1.0  ;;  %1040 = vmatpush.msrb.mxu2 %v912_v57  ;;  %1081 = vmatpush.msrb.mxu3 %v913_v18  ;;  %v921_v11 = vld [vmem:[#allocation7 + $0x268] sm:$0xff] }
 0x18e   : > { %985 = vmatmul.f32.gmra.mxu2 %v2407_v20  ;;  %970 = vmatmul.f32.vlgmr.msra.gmra.mxu0 %v2411_v32  ;;  %v797_v8 = vadd.f32 0.18741608, %v796_v60  ;;  %v758_v28 = vmul.f32 %v757_v50, %v2278_v29  ;;  %v493_v38 = vmul.f32 0.5, %v2049_v0  ;;  %v822_v41 = vand.u32 2147483648, %v2310_v42  ;;  %v915_v60 = vld [vmem:[#allocation7 + $0x238] sm:$0xff] }
 0x18f   : > { %v630_v59 = vmul.f32 2.1237322e-06, %v2409_v23  ;;  %v641_v5 = vmul.f32 3.8918573e-05, %v2409_v23  ;;  %1011 = vmatmul.f32.vlgmr.msra.gmra.mxu1 %v2411_v32  ;;  %v2420_v55 = vmul.f32 %v624_v1, %v600_v33  ;;  %1026 = vmatmul.f32.gmra.mxu3 %v2407_v20  ;;  %v814_v6 = vmul.f32 %v2369_v7, %v813_v56  ;;  %v888_v1 = vld [vmem:[#allocation7 + $0x160] sm:$0xff]  ;;  %v889_v33 = vld [vmem:[#allocation7 + $0x168] sm:$0xff] }
 0x190   : > { %v829_v4 = vadd.f32 1.0, %v1406_v40  ;;  %1041 = vmatpush.msrb.mxu2 %v906_v35  ;;  %v798_v63 = vmul.f32 %v797_v8, %v2177_v49  ;;  %1082 = vmatpush.msrb.mxu3 %v907_v48  ;;  %vm817_vm13 = vweird.f32 %v2369_v7  ;;  %v759_v54 = vadd.f32 1.1283791, %v758_v28  ;;  %v908_v56 = vld [vmem:[#allocation7 + $0x200] sm:$0xff] }
 0x191   : > { %v631_v45 = vadd.f32 0.00028619796, %v630_v59  ;;  %v642_v30 = vadd.f32 0.001143296, %v641_v5  ;;  %v1407_v52 = vclamps-f32 %v2420_v55, 1.0  ;;  %v815_v0 = vadd.f32 %v2369_v7, %v814_v6  ;;  %1121 = vmatpush.msrb.mxu0 %v920_v36  ;;  %1162 = vmatpush.msrb.mxu1 %v921_v11  ;;  %v882_v5 = vld [vmem:[#allocation7 + $0x130] sm:$0xff] }
 0x192   : > { %v2424_v12 = vpop.eup %1604  ;;  %1042 = vmatpush.msrb.mxu2 %v900_v26  ;;  %v782_v49 = vand.u32 2147483648, %v2399_v44  ;;  %1083 = vmatpush.msrb.mxu3 %v901_v34  ;;  %v2438_v27 = vmul.f32 %v829_v4, %v493_v38  ;;  %v780_v61 = vand.u32 2147483647, %v2399_v44  ;;  %v799_v50 = vadd.f32 1.1283791, %v798_v63  ;;  %v876_v48 = vld [vmem:[#allocation7 + $0x100] sm:$0xff] }
 0x193   : > { %v772_v17 = vmul.f32 %v2424_v12, %v2399_v44  ;;  %v632_v29 = vmul.f32 %v631_v45, %v2409_v23  ;;  %v643_v46 = vmul.f32 %v642_v30, %v2409_v23  ;;  %vm777_vm14 = vweird.f32 %v2424_v12  ;;  %1122 = vmatpush.msrb.mxu0 %v914_v58  ;;  %1163 = vmatpush.msrb.mxu1 %v915_v60  ;;  %v903_v30 = vld [vmem:[#allocation7 + $0x1d8] sm:$0xff]  ;;  %v877_v6 = vld [vmem:[#allocation7 + $0x108] sm:$0xff]  ;;  %v852_v60 = vld [vmem:[#allocation7 + $0x40] sm:$0xff] }
 0x194   : > { %1043 = vmatpush.msrb.mxu2 %v894_v24  ;;  %vm816_vm15 = vweird.f32 %v2310_v42  ;;  %v820_v22 = vand.u32 2147483647, %v2310_v42  ;;  %1084 = vmatpush.msrb.mxu3 %v895_v19  ;;  %v823_v57 = vor.u32 1.1754944e-38, %v822_v41  ;;  %vm776_vm1 = vweird.f32 %v2399_v44  ;;  %v909_v42 = vld [vmem:[#allocation7 + $0x208] sm:$0xff]  ;;  %v883_v44 = vld [vmem:[#allocation7 + $0x138] sm:$0xff] }
 0x195   : > { %v773_v47 = vsub.f32 1.0, %v772_v17  ;;  %v644_v43 = vadd.f32 0.014752088, %v643_v46  ;;  %v633_v16 = vadd.f32 0.0036580483, %v632_v29  ;;  %vm2449_vm0 = vmor %vm816_vm15, %vm817_vm13  ;;  %v783_v55 = vor.u32 1.1754944e-38, %v782_v49  ;;  %1123 = vmatpush.msrb.mxu0 %v908_v56  ;;  %1164 = vmatpush.msrb.mxu1 %v909_v42 }
 0x196   : > { %973 = vmatmul.f32.gmra.mxu0 %v2438_v27  ;;  %v819_v18 = vsel %vm2449_vm0, %v2369_v7, %v815_v0  ;;  %vm2461_vm2 = vmor %vm776_vm1, %vm777_vm14  ;;  %1044 = vmatpush.msrb.mxu2 %v888_v1  ;;  %v830_v35 = vadd.f32 1.0, %v1407_v52  ;;  %v760_v28 = vmul.f32 %v759_v54, %v2237_v51  ;;  %vm781_vm3 = vcmp.eq.f32.partialorder %v780_v61, 8.507059e+37  ;;  %v870_v29 = vld [vmem:[#allocation7 + $0xd0] sm:$0xff]  ;;  %v871_v36 = vld [vmem:[#allocation7 + $0xd8] sm:$0xff] }
 0x197   : > { %v774_v14 = vmul.f32 %v2424_v12, %v773_v47  ;;  %v645_v31 = vmul.f32 %v644_v43, %v2409_v23  ;;  %1014 = vmatmul.f32.gmra.mxu1 %v2438_v27  ;;  %v634_v8 = vmul.f32 %v633_v16, %v2409_v23  ;;  %1085 = vmatpush.msrb.mxu3 %v889_v33  ;;  %vm821_vm4 = vcmp.eq.f32.partialorder %v820_v22, 8.507059e+37  ;;  %v891_v24 = vld [vmem:[#allocation7 + $0x178] sm:$0xff]  ;;  %v864_v52 = vld [vmem:[#allocation7 + $0xa0] sm:$0xff]  ;;  %v865_v47 = vld [vmem:[#allocation7 + $0xa8] sm:$0xff] }
 0x198   : > { %1045 = vmatpush.msrb.mxu2 %v882_v5  ;;  %v494_v26 = vmul.f32 0.5, %v2043_v62  ;;  %v824_v51 = vsel %vm821_vm4, %v823_v57, %v819_v18  ;;  %1124 = vmatpush.msrb.mxu0 %v902_v10  ;;  %v800_v46 = vmul.f32 %v799_v50, %v2158_v21  ;;  %v890_v62 = vld [vmem:[#allocation7 + $0x170] sm:$0xff]  ;;  %v884_v43 = vld [vmem:[#allocation7 + $0x140] sm:$0xff]  ;;  %v498_v19 = vmul.f32 0.5, %v2217_v39  ;;  %v885_v49 = vld [vmem:[#allocation7 + $0x148] sm:$0xff] }
 0x199   : > { %v775_v40 = vadd.f32 %v2424_v12, %v774_v14  ;;  %v646_v59 = vadd.f32 0.112945676, %v645_v31  ;;  %1086 = vmatpush.msrb.mxu3 %v883_v44  ;;  %v635_v34 = vadd.f32 0.05243302, %v634_v8  ;;  %1165 = vmatpush.msrb.mxu1 %v903_v30  ;;  %v858_v16 = vld [vmem:[#allocation7 + $0x70] sm:$0xff]  ;;  %v859_v61 = vld [vmem:[#allocation7 + $0x78] sm:$0xff] }
 0x19a   : > { %1046 = vmatpush.msrb.mxu2 %v876_v48  ;;  %1125 = vmatpush.msrb.mxu0 %v896_v25  ;;  %v2474_v41 = vmul.f32 %v830_v35, %v494_v26  ;;  %v825_v11 = vmul.f32 %v824_v51, %v800_v46  ;;  %v878_v31 = vld [vmem:[#allocation7 + $0x110] sm:$0xff]  ;;  %v879_v39 = vld [vmem:[#allocation7 + $0x118] sm:$0xff]  ;;  %v853_v50 = vld [vmem:[#allocation7 + $0x48] sm:$0xff]  ;;  %v499_v5 = vmul.f32 0.5, %v2140_v2 }
 0x19b   : > { %v779_v7 = vsel %vm2461_vm2, %v2424_v12, %v775_v40  ;;  %v647_v45 = vmul.f32 %v646_v59, %v2409_v23  ;;  %v897_v12 = vld [vmem:[#allocation7 + $0x1a8] sm:$0xff]  ;;  %1087 = vmatpush.msrb.mxu3 %v877_v6  ;;  %v636_v0 = vmul.f32 %v635_v34, %v2409_v23  ;;  %v872_v22 = vld [vmem:[#allocation7 + $0xe0] sm:$0xff]  ;;  %v846_v56 = vld [vmem:[#allocation7 + $0x10] sm:$0xff] }
 0x19c   : > { %v784_v37 = vsel %vm781_vm3, %v783_v55, %v779_v7  ;;  %1166 = vmatpush.msrb.mxu1 %v897_v12  ;;  %1047 = vmatpush.msrb.mxu2 %v870_v29  ;;  %v1412_v14 = vclamps-f32 %v825_v11, 1.0  ;;  %v873_v33 = vld [vmem:[#allocation7 + $0xe8] sm:$0xff]  ;;  %v847_v57 = vld [vmem:[#allocation7 + $0x18] sm:$0xff]  ;;  %v866_v40 = vld [vmem:[#allocation7 + $0xb0] sm:$0xff]  ;;  %v495_v12 = vmul.f32 0.5, %v2374_v15 }
 0x19d   : > { %v785_v4 = vmul.f32 %v784_v37, %v760_v28  ;;  %v648_v17 = vadd.f32 0.4994258, %v647_v45  ;;  %1088 = vmatpush.msrb.mxu3 %v871_v36  ;;  %1126 = vmatpush.msrb.mxu0 %v890_v62  ;;  %v637_v1 = vadd.f32 0.18741608, %v636_v0  ;;  %v867_v42 = vld [vmem:[#allocation7 + $0xb8] sm:$0xff]  ;;  %v860_v55 = vld [vmem:[#allocation7 + $0x80] sm:$0xff] }
 0x19e   : > { %976 = vmatmul.f32.gmra.mxu0 %v2474_v41  ;;  %1167 = vmatpush.msrb.mxu1 %v891_v24  ;;  %v835_v3 = vadd.f32 1.0, %v1412_v14  ;;  %v861_v10 = vld [vmem:[#allocation7 + $0x88] sm:$0xff]  ;;  %v854_v35 = vld [vmem:[#allocation7 + $0x50] sm:$0xff]  ;;  %v855_v45 = vld [vmem:[#allocation7 + $0x58] sm:$0xff] }
 0x19f   : > { %v649_v38 = vmul.f32 %v648_v17, %v2409_v23  ;;  %v1411_v63 = vclamps-f32 %v785_v4, 1.0  ;;  %1017 = vmatmul.f32.gmra.mxu1 %v2474_v41  ;;  %1048 = vmatpush.msrb.mxu2 %v864_v52  ;;  %v638_v18 = vmul.f32 %v637_v1, %v2409_v23  ;;  %v848_v30 = vld [vmem:[#allocation7 + $0x20] sm:$0xff]  ;;  %v849_v37 = vld [vmem:[#allocation7 + $0x28] sm:$0xff] }
 0x1a0   : > { %1089 = vmatpush.msrb.mxu3 %v865_v47  ;;  %1127 = vmatpush.msrb.mxu0 %v884_v43  ;;  %v2490_v44 = vmul.f32 %v835_v3, %v499_v5 }
 0x1a1   : > { %v2476_v54 = vadd.f32 1.0, %v649_v38  ;;  %v834_v21 = vadd.f32 1.0, %v1411_v63  ;;  %1168 = vmatpush.msrb.mxu1 %v885_v49  ;;  %1049 = vmatpush.msrb.mxu2 %v858_v16  ;;  %v639_v7 = vadd.f32 1.1283791, %v638_v18 }
 0x1a2   : > { %1090 = vmatpush.msrb.mxu3 %v859_v61  ;;  %1128 = vmatpush.msrb.mxu0 %v878_v31 }
 0x1a3   : > { %1606 = vrcp.f32 %v2476_v54  ;;  %v2483_v58 = vmul.f32 %v834_v21, %v498_v19  ;;  %1169 = vmatpush.msrb.mxu1 %v879_v39  ;;  %1050 = vmatpush.msrb.mxu2 %v852_v60  ;;  %v662_v28 = vand.u32 2147483648, %v2476_v54  ;;  %v660_v23 = vand.u32 2147483647, %v2476_v54 }
 0x1a4   : > { %1091 = vmatpush.msrb.mxu3 %v853_v50  ;;  %1129 = vmatpush.msrb.mxu0 %v872_v22  ;;  %vm656_vm6 = vweird.f32 %v2476_v54  ;;  %v640_v25 = vmul.f32 %v639_v7, %v2392_v53 }
 0x1a5   : > { %988 = vmatmul.f32.gmra.mxu2 %v2483_v58  ;;  %1029 = vmatmul.f32.gmra.mxu3 %v2483_v58  ;;  %v663_v6 = vor.u32 1.1754944e-38, %v662_v28  ;;  %vm661_vm8 = vcmp.eq.f32.partialorder %v660_v23, 8.507059e+37 }
 0x1a6   : > { %1170 = vmatpush.msrb.mxu1 %v873_v33  ;;  %1051 = vmatpush.msrb.mxu2 %v846_v56 }
 0x1a7   : > { %1092 = vmatpush.msrb.mxu3 %v847_v57  ;;  %1130 = vmatpush.msrb.mxu0 %v866_v40 }
 0x1a8   : > { %1171 = vmatpush.msrb.mxu1 %v867_v42 }
 0x1a9   : > { %v1607_v59 = vpop.eup %1606  ;;  %1131 = vmatpush.msrb.mxu0 %v860_v55 }
 0x1aa   : > { %v652_v9 = vmul.f32 %v1607_v59, %v2476_v54  ;;  %vm657_vm5 = vweird.f32 %v1607_v59  ;;  %1172 = vmatpush.msrb.mxu1 %v861_v10 }
 0x1ab   : > { %1132 = vmatpush.msrb.mxu0 %v854_v35  ;;  %vm658_vm7 = vmor %vm656_vm6, %vm657_vm5 }
 0x1ac   : > { %v653_v8 = vsub.f32 1.0, %v652_v9  ;;  %1173 = vmatpush.msrb.mxu1 %v855_v45 }
 0x1ad   : > { %991 = vmatmul.f32.gmra.mxu2 %v2490_v44  ;;  %1032 = vmatmul.f32.gmra.mxu3 %v2490_v44 }
 0x1ae   : > { %v654_v2 = vmul.f32 %v1607_v59, %v653_v8  ;;  %1133 = vmatpush.msrb.mxu0 %v848_v30  ;;  %1174 = vmatpush.msrb.mxu1 %v849_v37 }
 0x1b0   : > { %v655_v48 = vadd.f32 %v1607_v59, %v654_v2 }
 0x1b2   : > { %v659_v26 = vsel %vm658_vm7, %v1607_v59, %v655_v48 }
 0x1b3   : > { %v664_v51 = vsel %vm661_vm8, %v663_v6, %v659_v26 }
 0x1b4   : > { %v665_v4 = vmul.f32 %v664_v51, %v640_v25 }
 0x1b5   : > { %1052 = vmatmul.f32.vlgmr.msrb.gmra.mxu2 %v2411_v32  ;;  %1093 = vmatmul.f32.vlgmr.msrb.gmra.mxu3 %v2411_v32 }
 0x1b6   : > { %v1408_v17 = vclamps-f32 %v665_v4, 1.0 }
 0x1b8   : > { %v831_v29 = vadd.f32 1.0, %v1408_v17 }
 0x1ba   : > { %v839_v46 = vmul.f32 %v831_v29, %v495_v12 }
 0x1bc   : > { %979 = vmatmul.f32.gmra.mxu0 %v839_v46  ;;  %1020 = vmatmul.f32.gmra.mxu1 %v839_v46 }
 0x1bd   : > { %1055 = vmatmul.f32.gmra.mxu2 %v2438_v27  ;;  %1096 = vmatmul.f32.gmra.mxu3 %v2438_v27 }
 0x1c4   : > { %1134 = vmatmul.f32.vlgmr.msrb.gmra.mxu0 %v2411_v32  ;;  %1175 = vmatmul.f32.vlgmr.msrb.gmra.mxu1 %v2411_v32 }
 0x1c5   : > { %1058 = vmatmul.f32.gmra.mxu2 %v2474_v41  ;;  %1099 = vmatmul.f32.gmra.mxu3 %v2474_v41 }
 0x1cc   : > { %1137 = vmatmul.f32.gmra.mxu0 %v2438_v27  ;;  %1178 = vmatmul.f32.gmra.mxu1 %v2438_v27 }
 0x1cd   : > { %1061 = vmatmul.f32.gmra.mxu2 %v839_v46  ;;  %1102 = vmatmul.f32.gmra.mxu3 %v839_v46 }
 0x1d4   : > { %1140 = vmatmul.f32.gmra.mxu0 %v2474_v41  ;;  %1181 = vmatmul.f32.gmra.mxu1 %v2474_v41 }
 0x1d5   : > { %1064 = vmatmul.f32.gmra.mxu2 %v2358_v13  ;;  %1105 = vmatmul.f32.gmra.mxu3 %v2358_v13 }
 0x1dc   : > { %1143 = vmatmul.f32.gmra.mxu0 %v839_v46  ;;  %1184 = vmatmul.f32.gmra.mxu1 %v839_v46 }
 0x1dd   : > { %1067 = vmatmul.f32.gmra.mxu2 %v2407_v20  ;;  %1108 = vmatmul.f32.gmra.mxu3 %v2407_v20 }
 0x1e4   : > { %1146 = vmatmul.f32.gmra.mxu0 %v2358_v13  ;;  %1187 = vmatmul.f32.gmra.mxu1 %v2358_v13  ;;  %v940_v13 = vld [vmem:[#allocation8] sm:$0x3f] }
 0x1e5   : > { %1070 = vmatmul.f32.gmra.mxu2 %v2483_v58  ;;  %1111 = vmatmul.f32.gmra.mxu3 %v2483_v58  ;;  %v942_v15 = vperm.slane %v940_v13, 0  ;;  %v943_v53 = vperm.slane %v940_v13, 1  ;;  %v2544_v22 = vperm.slane %v940_v13, 2  ;;  %v2546_v33 = vperm.slane %v940_v13, 3 }
 0x1e6   : > { %v2553_v9 = vperm.slane %v940_v13, 4  ;;  %v2555_v55 = vperm.slane %v940_v13, 5 }
 0x1ec   : > { %1149 = vmatmul.f32.gmra.mxu0 %v2407_v20  ;;  %1190 = vmatmul.f32.gmra.mxu1 %v2407_v20 }
 0x1ed   : > { %1073 = vmatmul.f32.gmra.mxu2 %v2490_v44  ;;  %1114 = vmatmul.f32.gmra.mxu3 %v2490_v44 }
 0x1f4   : > { %1152 = vmatmul.f32.gmra.mxu0 %v2483_v58  ;;  %1193 = vmatmul.f32.gmra.mxu1 %v2483_v58 }
 0x1fc   : > { %1155 = vmatmul.f32.gmra.mxu0 %v2490_v44  ;;  %1196 = vmatmul.f32.gmra.mxu1 %v2490_v44 }
 0x209   : > { %v983_v32 = vpop.f32.mrf.mxu2  ;;  %v1024_v34 = vpop.f32.mrf.mxu3 }
 0x20a   : > { %v984_v27 = vadd.f32 %v983_v32, %v942_v15  ;;  %v1025_v20 = vadd.f32 %v1024_v34, %v943_v53 }
 0x20b   : > { %v971_v36 = vpop.f32.mrf.mxu0 }
 0x20c   : > { %1212 = vst [vmem:[%s2528_s16 + $0x60] sm:$0xff] %v984_v27  ;;  %v1012_v38 = vpop.f32.mrf.mxu1  ;;  %v972_v63 = vadd.f32 %v971_v36, %v942_v15 }
 0x20d   : > { %1213 = vst [vmem:[%s2528_s16 + $0x68] sm:$0xff] %v1025_v20  ;;  %v1013_v41 = vadd.f32 %v1012_v38, %v943_v53 }
 0x20e   : > { %1200 = vst [vmem:[%s2528_s16] sm:$0xff] %v972_v63 }
 0x20f   : > { %1201 = vst [vmem:[%s2528_s16 + $0x8] sm:$0xff] %v1013_v41 }
 0x211   : > { %v986_v62 = vpop.f32.mrf.mxu2 }
 0x212   : > { %v987_v11 = vadd.f32 %v986_v62, %v942_v15  ;;  %v1027_v24 = vpop.f32.mrf.mxu3 }
 0x213   : > { %v1028_v52 = vadd.f32 %v1027_v24, %v943_v53  ;;  %v974_v54 = vpop.f32.mrf.mxu0 }
 0x214   : > { %1215 = vst [vmem:[%s2528_s16 + $0x78] sm:$0xff] %v987_v11  ;;  %v975_v21 = vadd.f32 %v974_v54, %v942_v15  ;;  %v1015_v47 = vpop.f32.mrf.mxu1 }
 0x215   : > { %1216 = vst [vmem:[%s2528_s16 + $0x80] sm:$0xff] %v1028_v52  ;;  %v1016_v43 = vadd.f32 %v1015_v47, %v943_v53 }
 0x216   : > { %1203 = vst [vmem:[%s2528_s16 + $0x18] sm:$0xff] %v975_v21 }
 0x217   : > { %1204 = vst [vmem:[%s2528_s16 + $0x20] sm:$0xff] %v1016_v43 }
 0x21b   : > { %v977_v19 = vpop.f32.mrf.mxu0 }
 0x21c   : > { %v978_v0 = vadd.f32 %v977_v19, %v942_v15  ;;  %v1018_v49 = vpop.f32.mrf.mxu1 }
 0x21d   : > { %v1019_v16 = vadd.f32 %v1018_v49, %v943_v53 }
 0x21e   : > { %1206 = vst [vmem:[%s2528_s16 + $0x30] sm:$0xff] %v978_v0 }
 0x21f   : > { %1207 = vst [vmem:[%s2528_s16 + $0x38] sm:$0xff] %v1019_v16 }
 0x228   : > { %v989_v58 = vpop.f32.mrf.mxu2  ;;  %v1030_v14 = vpop.f32.mrf.mxu3 }
 0x229   : > { %v990_v61 = vadd.f32 %v989_v58, %v942_v15  ;;  %v1031_v31 = vadd.f32 %v1030_v14, %v943_v53 }
 0x22b   : > { %1218 = vst [vmem:[%s2528_s16 + $0x90] sm:$0xff] %v990_v61 }
 0x22c   : > { %1219 = vst [vmem:[%s2528_s16 + $0x98] sm:$0xff] %v1031_v31 }
 0x230   : > { %v992_v39 = vpop.f32.mrf.mxu2  ;;  %v1033_v60 = vpop.f32.mrf.mxu3 }
 0x231   : > { %v993_v1 = vadd.f32 %v992_v39, %v942_v15  ;;  %v1034_v50 = vadd.f32 %v1033_v60, %v943_v53 }
 0x233   : > { %1221 = vst [vmem:[%s2528_s16 + $0xa8] sm:$0xff] %v993_v1 }
 0x234   : > { %1222 = vst [vmem:[%s2528_s16 + $0xb0] sm:$0xff] %v1034_v50 }
 0x238   : > { %v1053_v59 = vpop.f32.mrf.mxu2  ;;  %v1094_v42 = vpop.f32.mrf.mxu3 }
 0x239   : > { %v980_v56 = vpop.f32.mrf.mxu0  ;;  %v1021_v3 = vpop.f32.mrf.mxu1  ;;  %v1054_v5 = vadd.f32 %v1053_v59, %v2544_v22  ;;  %v1095_v18 = vadd.f32 %v1094_v42, %v2546_v33 }
 0x23a   : > { %v981_v57 = vadd.f32 %v980_v56, %v942_v15  ;;  %v1022_v40 = vadd.f32 %v1021_v3, %v943_v53 }
 0x23b   : > { %1202 = vst [vmem:[%s2528_s16 + $0x10] sm:$0xff] %v1054_v5 }
 0x23c   : > { %1209 = vst [vmem:[%s2528_s16 + $0x48] sm:$0xff] %v981_v57 }
 0x23d   : > { %1210 = vst [vmem:[%s2528_s16 + $0x50] sm:$0xff] %v1022_v40 }
 0x23e   : > { %1413 = vst [vmem:[%s2528_s16 + $0xc0] sm:$0xff] %v1095_v18 }
 0x240   : > { %v1056_v28 = vpop.f32.mrf.mxu2  ;;  %v1097_v7 = vpop.f32.mrf.mxu3 }
 0x241   : > { %v1135_v8 = vpop.f32.mrf.mxu0  ;;  %v1176_v44 = vpop.f32.mrf.mxu1  ;;  %v1057_v2 = vadd.f32 %v1056_v28, %v2544_v22  ;;  %v1098_v23 = vadd.f32 %v1097_v7, %v2546_v33 }
 0x242   : > { %v1136_v10 = vadd.f32 %v1135_v8, %v2553_v9  ;;  %v1177_v35 = vadd.f32 %v1176_v44, %v2555_v55 }
 0x243   : > { %1205 = vst [vmem:[%s2528_s16 + $0x28] sm:$0xff] %v1057_v2 }
 0x244   : > { %1414 = vst [vmem:[%s2528_s16 + $0xc8] sm:$0xff] %v1136_v10 }
 0x245   : > { %1415 = vst [vmem:[%s2528_s16 + $0xd0] sm:$0xff] %v1177_v35 }
 0x246   : > { %1416 = vst [vmem:[%s2528_s16 + $0xd8] sm:$0xff] %v1098_v23 }
 0x248   : > { %v1059_v6 = vpop.f32.mrf.mxu2  ;;  %v1100_v25 = vpop.f32.mrf.mxu3 }
 0x249   : > { %v1138_v45 = vpop.f32.mrf.mxu0  ;;  %v1179_v30 = vpop.f32.mrf.mxu1  ;;  %v1060_v26 = vadd.f32 %v1059_v6, %v2544_v22  ;;  %v1101_v51 = vadd.f32 %v1100_v25, %v2546_v33 }
 0x24a   : > { %v1139_v48 = vadd.f32 %v1138_v45, %v2553_v9  ;;  %v1180_v37 = vadd.f32 %v1179_v30, %v2555_v55 }
 0x24b   : > { %1208 = vst [vmem:[%s2528_s16 + $0x40] sm:$0xff] %v1060_v26 }
 0x24c   : > { %1417 = vst [vmem:[%s2528_s16 + $0xe0] sm:$0xff] %v1139_v48 }
 0x24d   : > { %1418 = vst [vmem:[%s2528_s16 + $0xe8] sm:$0xff] %v1180_v37 }
 0x24e   : > { %1419 = vst [vmem:[%s2528_s16 + $0xf0] sm:$0xff] %v1101_v51 }
 0x250   : > { %v1062_v46 = vpop.f32.mrf.mxu2  ;;  %v1103_v13 = vpop.f32.mrf.mxu3 }
 0x251   : > { %v1141_v4 = vpop.f32.mrf.mxu0  ;;  %v1182_v17 = vpop.f32.mrf.mxu1  ;;  %v1063_v15 = vadd.f32 %v1062_v46, %v2544_v22  ;;  %v1104_v53 = vadd.f32 %v1103_v13, %v2546_v33 }
 0x252   : > { %v1142_v12 = vadd.f32 %v1141_v4, %v2553_v9  ;;  %v1183_v29 = vadd.f32 %v1182_v17, %v2555_v55 }
 0x253   : > { %1211 = vst [vmem:[%s2528_s16 + $0x58] sm:$0xff] %v1063_v15 }
 0x254   : > { %1420 = vst [vmem:[%s2528_s16 + $0xf8] sm:$0xff] %v1142_v12 }
 0x255   : > { %1421 = vst [vmem:[%s2528_s16 + $0x100] sm:$0xff] %v1183_v29 }
 0x256   : > { %1422 = vst [vmem:[%s2528_s16 + $0x108] sm:$0xff] %v1104_v53 }
 0x258   : > { %v1065_v36 = vpop.f32.mrf.mxu2  ;;  %v1106_v38 = vpop.f32.mrf.mxu3 }
 0x259   : > { %v1144_v32 = vpop.f32.mrf.mxu0  ;;  %v1185_v27 = vpop.f32.mrf.mxu1  ;;  %v1066_v63 = vadd.f32 %v1065_v36, %v2544_v22  ;;  %v1107_v41 = vadd.f32 %v1106_v38, %v2546_v33 }
 0x25a   : > { %v1145_v34 = vadd.f32 %v1144_v32, %v2553_v9  ;;  %v1186_v20 = vadd.f32 %v1185_v27, %v2555_v55 }
 0x25b   : > { %1214 = vst [vmem:[%s2528_s16 + $0x70] sm:$0xff] %v1066_v63 }
 0x25c   : > { %1423 = vst [vmem:[%s2528_s16 + $0x110] sm:$0xff] %v1145_v34 }
 0x25d   : > { %1424 = vst [vmem:[%s2528_s16 + $0x118] sm:$0xff] %v1186_v20 }
 0x25e   : > { %1425 = vst [vmem:[%s2528_s16 + $0x120] sm:$0xff] %v1107_v41 }
 0x260   : > { %v1068_v54 = vpop.f32.mrf.mxu2  ;;  %v1109_v21 = vpop.f32.mrf.mxu3 }
 0x261   : > { %v1147_v62 = vpop.f32.mrf.mxu0  ;;  %v1188_v11 = vpop.f32.mrf.mxu1  ;;  %v1069_v47 = vadd.f32 %v1068_v54, %v2544_v22  ;;  %v1110_v43 = vadd.f32 %v1109_v21, %v2546_v33 }
 0x262   : > { %v1148_v24 = vadd.f32 %v1147_v62, %v2553_v9  ;;  %v1189_v52 = vadd.f32 %v1188_v11, %v2555_v55 }
 0x263   : > { %1217 = vst [vmem:[%s2528_s16 + $0x88] sm:$0xff] %v1069_v47 }
 0x264   : > { %1426 = vst [vmem:[%s2528_s16 + $0x128] sm:$0xff] %v1148_v24 }
 0x265   : > { %1427 = vst [vmem:[%s2528_s16 + $0x130] sm:$0xff] %v1189_v52 }
 0x266   : > { %1428 = vst [vmem:[%s2528_s16 + $0x138] sm:$0xff] %v1110_v43 }
 0x268   : > { %v1071_v58 = vpop.f32.mrf.mxu2  ;;  %v1112_v14 = vpop.f32.mrf.mxu3 }
 0x269   : > { %v1150_v19 = vpop.f32.mrf.mxu0  ;;  %v1191_v0 = vpop.f32.mrf.mxu1  ;;  %v1072_v61 = vadd.f32 %v1071_v58, %v2544_v22  ;;  %v1113_v31 = vadd.f32 %v1112_v14, %v2546_v33 }
 0x26a   : > { %v1151_v49 = vadd.f32 %v1150_v19, %v2553_v9  ;;  %v1192_v16 = vadd.f32 %v1191_v0, %v2555_v55 }
 0x26b   : > { %1220 = vst [vmem:[%s2528_s16 + $0xa0] sm:$0xff] %v1072_v61 }
 0x26c   : > { %1429 = vst [vmem:[%s2528_s16 + $0x140] sm:$0xff] %v1151_v49 }
 0x26d   : > { %1430 = vst [vmem:[%s2528_s16 + $0x148] sm:$0xff] %v1192_v16 }
 0x26e   : > { %1431 = vst [vmem:[%s2528_s16 + $0x150] sm:$0xff] %v1113_v31 }
 0x270   : > { %v1074_v56 = vpop.f32.mrf.mxu2  ;;  %v1115_v3 = vpop.f32.mrf.mxu3 }
 0x271   : > { %v1153_v39 = vpop.f32.mrf.mxu0  ;;  %v1194_v60 = vpop.f32.mrf.mxu1  ;;  %v1075_v57 = vadd.f32 %v1074_v56, %v2544_v22  ;;  %v1116_v40 = vadd.f32 %v1115_v3, %v2546_v33 }
 0x272   : > { %v1154_v1 = vadd.f32 %v1153_v39, %v2553_v9  ;;  %v1195_v50 = vadd.f32 %v1194_v60, %v2555_v55 }
 0x273   : > { %1223 = vst [vmem:[%s2528_s16 + $0xb8] sm:$0xff] %v1075_v57 }
 0x274   : > { %1432 = vst [vmem:[%s2528_s16 + $0x158] sm:$0xff] %v1154_v1 }
 0x275   : > { %1433 = vst [vmem:[%s2528_s16 + $0x160] sm:$0xff] %v1195_v50 }
 0x276   : > { %1434 = vst [vmem:[%s2528_s16 + $0x168] sm:$0xff] %v1116_v40 }
 0x279   : > { %v1156_v59 = vpop.f32.mrf.mxu0  ;;  %v1197_v42 = vpop.f32.mrf.mxu1 }
 0x27a   : > { %v1157_v5 = vadd.f32 %v1156_v59, %v2553_v9  ;;  %v1198_v18 = vadd.f32 %v1197_v42, %v2555_v55 }
 0x27c   : > { %1435 = vst [vmem:[%s2528_s16 + $0x170] sm:$0xff] %v1157_v5 }
 0x27d   : > { %1436 = vst [vmem:[%s2528_s16 + $0x178] sm:$0xff] %v1198_v18 }
 0x27e   : > { %s1476_s23 = smul.u32 192, %s1842_s22  ;;  %s1273_s9 = sshll.u32 %s2528_s16, 4  ;;  %s1274_s9 = int_to_ptr.vmem [resolvable:$true] %s1273_s9 }
 0x27f   : > { %s1784_s8 = smov 3072   ;;  %s1785_s15 = smov 6144  }
 0x280   : > { %s1262_s12 = scalar_lea.hbm %s2661_s5, %s1476_s23  ;;  %1491 = sst [smem:[#allocation12]] (%p1904_p7), %s1784_s8 }
 0x281   : > { %s1275_s13 = sshll.u32 %s1262_s12, 4  ;;  %1492 = sst [smem:[#allocation12 + $0x1]] (%p1904_p7), %s1785_s15  ;;  %s1276_s13 = int_to_ptr.hbm [resolvable:$true] %s1275_s13 }
 0x282   : > { %s1786_s30 = smov 8   ;;  %s1787_s22 = smov 384  }
 0x283   : > { %1493 = sst [smem:[#allocation12 + $0x2]] (%p1904_p7), %s1786_s30  ;;  %s1788_s26 = smov 24  }
 0x284   : > { %1494 = sst [smem:[#allocation12 + $0x3]] (%p1904_p7), %s1787_s22  ;;  %s1789_s28 = smov [#allocation11]  }
 0x285   : > { %1495 = sst [smem:[#allocation12 + $0x4]] (%p1904_p7), %s1787_s22  ;;  %s1790_s24 = smov 0  }
 0x286   : > { %1496 = sst [smem:[#allocation12 + $0x5]] (%p1904_p7), %s1788_s26 }
 0x287   : > { %1497 = dma.general (%p1904_p7), %s1274_s9, 6144, %s1276_s13, %s1250_s17, %s1789_s28, [#allocation12], %s1790_s24, 0  }
 0x288 PF: > { %s1303_s29 = sand.u32 1, %s1762_s18   ;;  %p2688_p1 = scmp.ge.s32.totalorder %s1774_s21, 2 }
 0x289   : > { %s1304_s14 = scalar_lea.sflag [#allocation4], %s1303_s29 }
 0x28a   : > { %p1514_p4 = pnand %p2688_p1, %p1856_p6 }
 0x28c   : > { %p1515_p8 = pneg %p1514_p4 }
 0x28e   : > { %1757 = dma.done.wait (%p1515_p8), %s1304_s14, 6144  }
 0x28f   : > { %1759 = vsyncadd (%p1515_p8), %s1304_s14, 4294961152  ;;  %p20_p9 = scmp.ge.s32.totalorder %s1890_s27, 4   ;;  %s2689_s18 = smov %s1766_s19 }
 0x290   : > { %s2690_s19 = smov %s1770_s20  ;;  %s2691_s20 = smov %s1900_s6 }
 0x291   : > { %s2692_s21 = smov %s1890_s27  ;;  %22 = sbr.rel (!%p20_p9) target bundleno = 7 (0x7), region = 103 }
 0x296   :  { %1310 = vsyncpa [#allocation3], 1 }
 0x297   :  { %1312 = vsyncpa [#allocation3 + $0x1], 1 }
 0x298   :  { %1313 = vsyncpa [#allocation6], 1 }
 0x299   :  { %1314 = vsyncpa [#allocation9], 1 }
 0x29a   :  { %1315 = vsyncpa [#allocation4], 1 }
 0x29b   :  { %1317 = vsyncpa [#allocation4 + $0x1], 1 }

</bundles_post_ra>
